<compile_context>
chip_gen: v7x
topology: tpu7x:2x2x1
jax: 0.10.0
libtpu: 0.0.40
codegen_flags: <defaults>
</compile_context>

<pallas_src>
import jax
import jax.numpy as jnp
import numpy as np
from jax import lax
from jax.experimental import pallas as pl
from jax.experimental.pallas import tpu as pltpu

EPS = 1e-5
DOT_DTYPE = jnp.bfloat16      # MXU operand dtype (accumulation stays f32)
INTER_DTYPE = jnp.bfloat16    # HBM dtype of the y / shortcut intermediates
VMEM_LIMIT = 48 * 1024 * 1024  # fits v7x's 64 MiB/TC with headroom; v5e/v6e have 128 MiB


# ---------------------------------------------------------------------------
# Kernels
# ---------------------------------------------------------------------------

def _make_conv1_kernel(*, s, cin, cout, Ho, Wo, has_down):
    """BN1+ReLU + 3x3/stride-s conv (+ fused 1x1 shortcut) + BN2 partial stats.

    Input layout is phase-major (s*s, Ho, Wo, cin): phase p = ph*s+pw holds the
    pixels (h % s == ph, w % s == pw), so every conv tap is a unit-stride slice.
    The 9 tap patches are concatenated along the lane axis into one im2col LHS
    and multiplied by the (9*cin, cout) weight matrix in a single MXU matmul.
    """
    SS = s * s
    pad_b = 1 if s == 1 else 0                      # bottom/right halo only for s == 1
    Hp, Wp = Ho + 1 + pad_b, Wo + 1 + pad_b

    def kernel(*refs):
        if has_down:
            (x_ref, g1_ref, b1_ref, w1_ref, gd_ref, bd_ref, wd_ref,
             y_ref, ysum_ref, yss_ref, sc_ref, pad_scr) = refs
        else:
            (x_ref, g1_ref, b1_ref, w1_ref,
             y_ref, ysum_ref, yss_ref, pad_scr) = refs

        x = x_ref[0]                                # (SS, Ho, Wo, cin), f32
        # BN affine + ReLU (the module pads AFTER BN+ReLU, inside the conv).
        act = jnp.maximum(x * g1_ref[...] + b1_ref[...], 0.0)

        # Zero halo strips + write the interior into the padded VMEM scratch.
        # Re-zeroed every step: a program_id(0)==0 guard would break when this
        # "parallel" axis is megacore-partitioned (per-core scratch, only one
        # core sees step 0).
        pad_scr[:, 0:1, :, :] = jnp.zeros((SS, 1, Wp, cin), jnp.float32)
        pad_scr[:, :, 0:1, :] = jnp.zeros((SS, Hp, 1, cin), jnp.float32)
        if pad_b:
            pad_scr[:, Hp - 1:Hp, :, :] = jnp.zeros((SS, 1, Wp, cin), jnp.float32)
            pad_scr[:, :, Wp - 1:Wp, :] = jnp.zeros((SS, Hp, 1, cin), jnp.float32)
        pad_scr[:, 1:1 + Ho, 1:1 + Wo, :] = act

        # im2col: 9 unit-stride tap windows -> one K = 9*cin MXU matmul.
        cols = []
        for dh in range(3):
            bh, ph = divmod(dh - 1 + s, s)
            bh -= 1
            for dw in range(3):
                bw, pw = divmod(dw - 1 + s, s)
                bw -= 1
                p = ph * s + pw
                patch = pad_scr[p, 1 + bh:1 + bh + Ho, 1 + bw:1 + bw + Wo, :]
                cols.append(patch.reshape(Ho * Wo, cin))
        lhs = jnp.concatenate(cols, axis=-1).astype(w1_ref.dtype)   # (Ho*Wo, 9*cin)
        acc = jnp.dot(lhs, w1_ref[...], preferred_element_type=jnp.float32)

        y_ref[0] = acc.reshape(Ho, Wo, cout).astype(y_ref.dtype)
        # BN2 batch-stat partials fused here, from the f32 accumulator
        # (y is never re-read from HBM and the bf16 store does not perturb them).
        ysum_ref[0] = jnp.sum(acc, axis=0, keepdims=True)
        yss_ref[0] = jnp.sum(acc * acc, axis=0, keepdims=True)

        if has_down:
            # 1x1 stride-s shortcut conv == phase (0, 0) of x; no stride handling.
            actd = jnp.maximum(x[0] * gd_ref[...] + bd_ref[...], 0.0)
            scd = jnp.dot(actd.reshape(Ho * Wo, cin).astype(wd_ref.dtype),
                          wd_ref[...], preferred_element_type=jnp.float32)
            sc_ref[0] = scd.reshape(Ho, Wo, cout).astype(sc_ref.dtype)

    return kernel


def _make_conv2_kernel(*, cout, Ho, Wo):
    """BN2+ReLU + 3x3/stride-1 conv (9 accumulating dots) + residual add."""
    Hp, Wp = Ho + 2, Wo + 2

    def kernel(y_ref, g2_ref, b2_ref, w2_ref, res_ref, out_ref, pad_scr):
        act = jnp.maximum(
            y_ref[0].astype(jnp.float32) * g2_ref[...] + b2_ref[...], 0.0)

        # Halo zeroing every step (see conv1 kernel comment).
        pad_scr[0:1, :, :] = jnp.zeros((1, Wp, cout), jnp.float32)
        pad_scr[Hp - 1:Hp, :, :] = jnp.zeros((1, Wp, cout), jnp.float32)
        pad_scr[:, 0:1, :] = jnp.zeros((Hp, 1, cout), jnp.float32)
        pad_scr[:, Wp - 1:Wp, :] = jnp.zeros((Hp, 1, cout), jnp.float32)
        pad_scr[1:1 + Ho, 1:1 + Wo, :] = act

        # 9 accumulating K = cout dots (no 9x im2col scratch: bounded VMEM on
        # v7x, no extra full-activation copy passes on v5e's single store slot).
        acc = jnp.zeros((Ho * Wo, cout), jnp.float32)
        for t in range(9):
            dh, dw = divmod(t, 3)
            win = pad_scr[dh:dh + Ho, dw:dw + Wo, :]
            acc = acc + jnp.dot(win.reshape(Ho * Wo, cout).astype(w2_ref.dtype),
                                w2_ref[t], preferred_element_type=jnp.float32)

        # Residual added in-register; one lane store of exactly cout channels.
        out = acc.reshape(Ho, Wo, cout) + res_ref[0].astype(jnp.float32)
        out_ref[0] = out.astype(out_ref.dtype)

    return kernel


# ---------------------------------------------------------------------------
# pallas_call wrappers
# ---------------------------------------------------------------------------

def fused_conv1(x_ph, scale1, bias1, w1_mat, down, *, s, cin, cout):
    N, SS, Ho, Wo, _ = x_ph.shape
    has_down = down is not None
    kernel = _make_conv1_kernel(s=s, cin=cin, cout=cout, Ho=Ho, Wo=Wo,
                                has_down=has_down)
    in_specs = [
        pl.BlockSpec((1, SS, Ho, Wo, cin), lambda n: (n, 0, 0, 0, 0)),
        pl.BlockSpec((1, cin), lambda n: (0, 0)),
        pl.BlockSpec((1, cin), lambda n: (0, 0)),
        pl.BlockSpec((9 * cin, cout), lambda n: (0, 0)),
    ]
    args = [x_ph, scale1.reshape(1, cin), bias1.reshape(1, cin), w1_mat]
    out_shape = [jax.ShapeDtypeStruct((N, Ho, Wo, cout), INTER_DTYPE),
                 jax.ShapeDtypeStruct((N, 1, cout), jnp.float32),
                 jax.ShapeDtypeStruct((N, 1, cout), jnp.float32)]
    out_specs = [pl.BlockSpec((1, Ho, Wo, cout), lambda n: (n, 0, 0, 0)),
                 pl.BlockSpec((1, 1, cout), lambda n: (n, 0, 0)),
                 pl.BlockSpec((1, 1, cout), lambda n: (n, 0, 0))]
    if has_down:
        scale_d, bias_d, wd_mat = down
        in_specs += [pl.BlockSpec((1, cin), lambda n: (0, 0)),
                     pl.BlockSpec((1, cin), lambda n: (0, 0)),
                     pl.BlockSpec((cin, cout), lambda n: (0, 0))]
        args += [scale_d.reshape(1, cin), bias_d.reshape(1, cin), wd_mat]
        out_shape.append(jax.ShapeDtypeStruct((N, Ho, Wo, cout), INTER_DTYPE))
        out_specs.append(pl.BlockSpec((1, Ho, Wo, cout), lambda n: (n, 0, 0, 0)))
    pad_b = 1 if s == 1 else 0
    return pl.pallas_call(
        kernel,
        out_shape=tuple(out_shape),
        grid=(N,),
        in_specs=in_specs,
        out_specs=tuple(out_specs),
        scratch_shapes=[pltpu.VMEM((SS, Ho + 1 + pad_b, Wo + 1 + pad_b, cin),
                                   jnp.float32)],
        compiler_params=pltpu.CompilerParams(
            dimension_semantics=("parallel",), vmem_limit_bytes=VMEM_LIMIT),
    )(*args)


def fused_conv2(y, scale2, bias2, w2_pal, residual, *, cout):
    N, Ho, Wo, _ = y.shape
    kernel = _make_conv2_kernel(cout=cout, Ho=Ho, Wo=Wo)
    return pl.pallas_call(
        kernel,
        out_shape=jax.ShapeDtypeStruct((N, Ho, Wo, cout), jnp.float32),
        grid=(N,),
        in_specs=[pl.BlockSpec((1, Ho, Wo, cout), lambda n: (n, 0, 0, 0)),
                  pl.BlockSpec((1, cout), lambda n: (0, 0)),
                  pl.BlockSpec((1, cout), lambda n: (0, 0)),
                  pl.BlockSpec((9, cout, cout), lambda n: (0, 0, 0)),
                  pl.BlockSpec((1, Ho, Wo, cout), lambda n: (n, 0, 0, 0))],
        out_specs=pl.BlockSpec((1, Ho, Wo, cout), lambda n: (n, 0, 0, 0)),
        scratch_shapes=[pltpu.VMEM((Ho + 2, Wo + 2, cout), jnp.float32)],
        compiler_params=pltpu.CompilerParams(
            dimension_semantics=("parallel",), vmem_limit_bytes=VMEM_LIMIT),
    )(y, scale2.reshape(1, cout), bias2.reshape(1, cout), w2_pal, residual)


# ---------------------------------------------------------------------------
# PreActBlock (JAX / Pallas)
# ---------------------------------------------------------------------------

class PreActBlockPallas:
    expansion = 1

    def __init__(self, in_channels, out_channels, stride=1, *, key):
        self.stride = stride
        self.in_channels = in_channels
        self.out_channels = out_channels
        k1, k2, k3 = jax.random.split(key, 3)
        w1 = 0.2 * jax.random.normal(k1, (out_channels, in_channels, 3, 3), jnp.float32)
        w2 = 0.2 * jax.random.normal(k2, (out_channels, out_channels, 3, 3), jnp.float32)
        self.w1 = jnp.transpose(w1, (2, 3, 1, 0))      # HWIO (for the reference)
        self.w2 = jnp.transpose(w2, (2, 3, 1, 0))
        self.bn1_gamma = 1.0 + 0.1 * jnp.arange(in_channels, dtype=jnp.float32)
        self.bn1_beta = 0.05 * jnp.arange(in_channels, dtype=jnp.float32) - 0.1
        self.bn2_gamma = 1.0 - 0.05 * jnp.arange(out_channels, dtype=jnp.float32)
        self.bn2_beta = 0.02 * jnp.arange(out_channels, dtype=jnp.float32)

        # Kernel-side weight layouts, built ONCE (bf16 MXU operands, compact
        # channel count -- no 128-lane padding of the outputs any more).
        self.w1_mat = self.w1.reshape(9 * in_channels, out_channels).astype(DOT_DTYPE)
        self.w2_pal = self.w2.reshape(9, out_channels, out_channels).astype(DOT_DTYPE)

        self.has_downsample = (stride != 1) or (in_channels != out_channels)
        if self.has_downsample:
            wd = 0.2 * jax.random.normal(k3, (out_channels, in_channels, 1, 1), jnp.float32)
            self.wd = jnp.transpose(wd, (2, 3, 1, 0))[0, 0]          # (Cin, Cout) reference
            self.wd_mat = self.wd.astype(DOT_DTYPE)
            self.bnd_gamma = 1.0 + 0.07 * jnp.arange(in_channels, dtype=jnp.float32)
            self.bnd_beta = -0.03 * jnp.arange(in_channels, dtype=jnp.float32)

    def __call__(self, x_nchw):
        s = self.stride
        cin, cout = self.in_channels, self.out_channels
        N, C, H, W = x_nchw.shape
        assert C == cin and H % s == 0 and W % s == 0
        Ho, Wo = H // s, W // s
        x = x_nchw.astype(jnp.float32)

        # BN1 batch statistics from raw NCHW x.  Both the reduction and the
        # phase-major transpose below consume x, so XLA can multi-output-fuse
        # them into a single read of x (no separate stats pass over x_ph).
        # (E[x^2]-mean^2 with a zero clamp; fine for normalized inputs.)
        mean1 = jnp.mean(x, axis=(0, 2, 3))
        var1 = jnp.maximum(jnp.mean(x * x, axis=(0, 2, 3)) - mean1 * mean1, 0.0)
        inv1 = lax.rsqrt(var1 + EPS)
        scale1 = self.bn1_gamma * inv1
        bias1 = self.bn1_beta - mean1 * scale1

        # Single relayout pass over x: NCHW -> phase-major (N, s*s, H/s, W/s, C).
        xr = x.reshape(N, C, Ho, s, Wo, s)
        x_ph = jnp.transpose(xr, (0, 3, 5, 2, 4, 1)).reshape(N, s * s, Ho, Wo, C)

        down = None
        if self.has_downsample:
            scale_d = self.bnd_gamma * inv1
            bias_d = self.bnd_beta - mean1 * scale_d
            down = (scale_d, bias_d, self.wd_mat)

        # ---- conv1 (BN1+ReLU+3x3/stride-s) + fused shortcut + BN2 partials ----
        outs = fused_conv1(x_ph, scale1, bias1, self.w1_mat, down,
                           s=s, cin=cin, cout=cout)
        if self.has_downsample:
            y, ysum, yss, sc = outs
        else:
            y, ysum, yss = outs
            sc = x_ph[:, 0]                           # identity shortcut (s == 1, cin == cout)

        # ---- BN2 statistics from the fused partials (no extra pass over y) ----
        m2 = float(N * Ho * Wo)
        mean2 = jnp.sum(ysum[:, 0, :], axis=0) / m2
        var2 = jnp.maximum(jnp.sum(yss[:, 0, :], axis=0) / m2 - mean2 * mean2, 0.0)
        scale2 = self.bn2_gamma * lax.rsqrt(var2 + EPS)
        bias2 = self.bn2_beta - mean2 * scale2

        # ---- conv2 (BN2+ReLU+3x3/stride-1) with the residual add fused ----
        out = fused_conv2(y, scale2, bias2, self.w2_pal, sc, cout=cout)
        return jnp.transpose(out, (0, 3, 1, 2))       # NHWC -> NCHW


# ---------------------------------------------------------------------------
# Pure-JAX reference (for correctness checking)
# ---------------------------------------------------------------------------

def _reference_forward(block, x_nchw):
    x = jnp.transpose(x_nchw.astype(jnp.float32), (0, 2, 3, 1))

    def bn_relu(v, gamma, beta):
        mean = jnp.mean(v, axis=(0, 1, 2))
        var = jnp.mean(jnp.square(v - mean), axis=(0, 1, 2))
        return jnp.maximum((v - mean) * lax.rsqrt(var + EPS) * gamma + beta, 0.0)

    def conv(v, w_hwio, stride, pad):
        return lax.conv_general_dilated(
            v, w_hwio, (stride, stride), ((pad, pad), (pad, pad)),
            dimension_numbers=('NHWC', 'HWIO', 'NHWC'))

    y = conv(bn_relu(x, block.bn1_gamma, block.bn1_beta), block.w1, block.stride, 1)
    y = conv(bn_relu(y, block.bn2_gamma, block.bn2_beta), block.w2, 1, 1)
    if block.has_downsample:
        wd = block.wd[None, None]                                 # (1,1,Cin,Cout)
        sc = conv(bn_relu(x, block.bnd_gamma, block.bnd_beta), wd, block.stride, 0)
    else:
        sc = x
    return jnp.transpose(sc + y, (0, 3, 1, 2))


if __name__ == "__main__":
    key = jax.random.PRNGKey(0)
    kx, kp1, kp2 = jax.random.split(key, 3)

    # Tolerance loosened vs the f32 version: bf16 MXU operands and bf16 y / sc
    # intermediates (accumulation stays f32).
    RTOL = ATOL = 3e-2

    # Case 1: downsampling block (stride=2, channel expansion 4 -> 8).
    x1 = jax.random.normal(kx, (2, 4, 16, 16), jnp.float32)       # NCHW
    blk1 = PreActBlockPallas(4, 8, stride=2, key=kp1)
    out1 = jax.block_until_ready(jax.jit(blk1)(x1))
    ref1 = _reference_forward(blk1, x1)
    assert out1.shape == (2, 8, 8, 8)
    np.testing.assert_allclose(np.asarray(out1), np.asarray(ref1), rtol=RTOL, atol=ATOL)

    # Case 2: identity-shortcut block (stride=1, same channels).
    x2 = jax.random.normal(kx, (2, 4, 16, 16), jnp.float32)
    blk2 = PreActBlockPallas(4, 4, stride=1, key=kp2)
    out2 = jax.block_until_ready(jax.jit(blk2)(x2))
    ref2 = _reference_forward(blk2, x2)
    assert out2.shape == (2, 4, 16, 16)
    np.testing.assert_allclose(np.asarray(out2), np.asarray(ref2), rtol=RTOL, atol=ATOL)

    print("KERNEL_OK")
</pallas_src>

<mosaic_0001>
module attributes {stable_mosaic.version = 11 : i64} {
  func.func @kernel(%arg0: i32, %arg1: memref<1x4x8x8x4xf32, #tpu.memory_space<vmem>>, %arg2: memref<1x4xf32, #tpu.memory_space<vmem>>, %arg3: memref<1x4xf32, #tpu.memory_space<vmem>>, %arg4: memref<36x8xbf16, #tpu.memory_space<vmem>>, %arg5: memref<1x4xf32, #tpu.memory_space<vmem>>, %arg6: memref<1x4xf32, #tpu.memory_space<vmem>>, %arg7: memref<4x8xbf16, #tpu.memory_space<vmem>>, %arg8: memref<1x8x8x8xbf16, #tpu.memory_space<vmem>>, %arg9: memref<1x1x8xf32, #tpu.memory_space<vmem>>, %arg10: memref<1x1x8xf32, #tpu.memory_space<vmem>>, %arg11: memref<1x8x8x8xbf16, #tpu.memory_space<vmem>>, %arg12: memref<4x9x9x4xf32, #tpu.memory_space<vmem>>) attributes {dimension_semantics = [#tpu.dimension_semantics<parallel>], iteration_bounds = array<i64: 2>, scalar_prefetch = 0 : i64, scratch_operands = 1 : i64, tpu.core_type = #tpu.core_type<tc>, window_params = [{transform_indices = @transform_0, window_bounds = array<i64: 1, 4, 8, 8, 4>}, {pipeline_mode = #tpu.pipeline_mode<synchronous>, transform_indices = @transform_1, window_bounds = array<i64: 1, 4>}, {pipeline_mode = #tpu.pipeline_mode<synchronous>, transform_indices = @transform_2, window_bounds = array<i64: 1, 4>}, {pipeline_mode = #tpu.pipeline_mode<synchronous>, transform_indices = @transform_3, window_bounds = array<i64: 36, 8>}, {pipeline_mode = #tpu.pipeline_mode<synchronous>, transform_indices = @transform_4, window_bounds = array<i64: 1, 4>}, {pipeline_mode = #tpu.pipeline_mode<synchronous>, transform_indices = @transform_5, window_bounds = array<i64: 1, 4>}, {pipeline_mode = #tpu.pipeline_mode<synchronous>, transform_indices = @transform_6, window_bounds = array<i64: 4, 8>}, {transform_indices = @transform_7, window_bounds = array<i64: 1, 8, 8, 8>}, {transform_indices = @transform_8, window_bounds = array<i64: 1, 1, 8>}, {transform_indices = @transform_9, window_bounds = array<i64: 1, 1, 8>}, {transform_indices = @transform_10, window_bounds = array<i64: 1, 8, 8, 8>}]} {
    %c0 = arith.constant 0 : index
    %c0_0 = arith.constant 0 : index
    %c0_1 = arith.constant 0 : index
    %c0_2 = arith.constant 0 : index
    %c0_3 = arith.constant 0 : index
    %0 = vector.load %arg1[%c0, %c0_0, %c0_1, %c0_2, %c0_3] : memref<1x4x8x8x4xf32, #tpu.memory_space<vmem>>, vector<1x4x8x8x4xf32>
    %1 = vector.shape_cast %0 : vector<1x4x8x8x4xf32> to vector<4x8x8x4xf32>
    %c0_4 = arith.constant 0 : index
    %c0_5 = arith.constant 0 : index
    %2 = vector.load %arg2[%c0_4, %c0_5] : memref<1x4xf32, #tpu.memory_space<vmem>>, vector<1x4xf32>
    %3 = vector.shape_cast %2 : vector<1x4xf32> to vector<1x1x1x4xf32>
    %4 = vector.broadcast %3 : vector<1x1x1x4xf32> to vector<4x8x8x4xf32>
    %5 = arith.mulf %1, %4 : vector<4x8x8x4xf32>
    %c0_6 = arith.constant 0 : index
    %c0_7 = arith.constant 0 : index
    %6 = vector.load %arg3[%c0_6, %c0_7] : memref<1x4xf32, #tpu.memory_space<vmem>>, vector<1x4xf32>
    %7 = vector.shape_cast %6 : vector<1x4xf32> to vector<1x1x1x4xf32>
    %8 = vector.broadcast %7 : vector<1x1x1x4xf32> to vector<4x8x8x4xf32>
    %9 = arith.addf %5, %8 : vector<4x8x8x4xf32>
    %cst = arith.constant 0.000000e+00 : f32
    %10 = vector.broadcast %cst : f32 to vector<4x8x8x4xf32>
    %11 = arith.maximumf %9, %10 : vector<4x8x8x4xf32>
    %cst_8 = arith.constant 0.000000e+00 : f32
    %12 = vector.broadcast %cst_8 : f32 to vector<4x1x9x4xf32>
    %c0_9 = arith.constant 0 : index
    %c0_10 = arith.constant 0 : index
    %c0_11 = arith.constant 0 : index
    %c0_12 = arith.constant 0 : index
    %13 = vector.load %arg12[%c0_9, %c0_10, %c0_11, %c0_12] : memref<4x9x9x4xf32, #tpu.memory_space<vmem>>, vector<4x1x9x4xf32>
    tpu.vector_store %arg12[%c0_9, %c0_10, %c0_11, %c0_12], %12 {strides = array<i32>} : memref<4x9x9x4xf32, #tpu.memory_space<vmem>>, vector<4x1x9x4xf32>,
    %cst_13 = arith.constant 0.000000e+00 : f32
    %14 = vector.broadcast %cst_13 : f32 to vector<4x9x1x4xf32>
    %c0_14 = arith.constant 0 : index
    %c0_15 = arith.constant 0 : index
    %c0_16 = arith.constant 0 : index
    %c0_17 = arith.constant 0 : index
    %15 = vector.load %arg12[%c0_14, %c0_15, %c0_16, %c0_17] : memref<4x9x9x4xf32, #tpu.memory_space<vmem>>, vector<4x9x1x4xf32>
    tpu.vector_store %arg12[%c0_14, %c0_15, %c0_16, %c0_17], %14 {strides = array<i32>} : memref<4x9x9x4xf32, #tpu.memory_space<vmem>>, vector<4x9x1x4xf32>,
    %c0_18 = arith.constant 0 : index
    %c1 = arith.constant 1 : index
    %c1_19 = arith.constant 1 : index
    %c0_20 = arith.constant 0 : index
    %16 = vector.load %arg12[%c0_18, %c1, %c1_19, %c0_20] : memref<4x9x9x4xf32, #tpu.memory_space<vmem>>, vector<4x8x8x4xf32>
    tpu.vector_store %arg12[%c0_18, %c1, %c1_19, %c0_20], %11 {strides = array<i32>} : memref<4x9x9x4xf32, #tpu.memory_space<vmem>>, vector<4x8x8x4xf32>,
    %c3 = arith.constant 3 : index
    %c0_21 = arith.constant 0 : index
    %c0_22 = arith.constant 0 : index
    %c0_23 = arith.constant 0 : index
    %17 = vector.load %arg12[%c3, %c0_21, %c0_22, %c0_23] : memref<4x9x9x4xf32, #tpu.memory_space<vmem>>, vector<1x8x8x4xf32>
    %18 = vector.shape_cast %17 : vector<1x8x8x4xf32> to vector<8x8x4xf32>
    %19 = vector.shape_cast %18 : vector<8x8x4xf32> to vector<64x4xf32>
    %c2 = arith.constant 2 : index
    %c0_24 = arith.constant 0 : index
    %c1_25 = arith.constant 1 : index
    %c0_26 = arith.constant 0 : index
    %20 = vector.load %arg12[%c2, %c0_24, %c1_25, %c0_26] : memref<4x9x9x4xf32, #tpu.memory_space<vmem>>, vector<1x8x8x4xf32>
    %21 = vector.shape_cast %20 : vector<1x8x8x4xf32> to vector<8x8x4xf32>
    %22 = vector.shape_cast %21 : vector<8x8x4xf32> to vector<64x4xf32>
    %c3_27 = arith.constant 3 : index
    %c0_28 = arith.constant 0 : index
    %c1_29 = arith.constant 1 : index
    %c0_30 = arith.constant 0 : index
    %23 = vector.load %arg12[%c3_27, %c0_28, %c1_29, %c0_30] : memref<4x9x9x4xf32, #tpu.memory_space<vmem>>, vector<1x8x8x4xf32>
    %24 = vector.shape_cast %23 : vector<1x8x8x4xf32> to vector<8x8x4xf32>
    %25 = vector.shape_cast %24 : vector<8x8x4xf32> to vector<64x4xf32>
    %c1_31 = arith.constant 1 : index
    %c1_32 = arith.constant 1 : index
    %c0_33 = arith.constant 0 : index
    %c0_34 = arith.constant 0 : index
    %26 = vector.load %arg12[%c1_31, %c1_32, %c0_33, %c0_34] : memref<4x9x9x4xf32, #tpu.memory_space<vmem>>, vector<1x8x8x4xf32>
    %27 = vector.shape_cast %26 : vector<1x8x8x4xf32> to vector<8x8x4xf32>
    %28 = vector.shape_cast %27 : vector<8x8x4xf32> to vector<64x4xf32>
    %c0_35 = arith.constant 0 : index
    %c1_36 = arith.constant 1 : index
    %c1_37 = arith.constant 1 : index
    %c0_38 = arith.constant 0 : index
    %29 = vector.load %arg12[%c0_35, %c1_36, %c1_37, %c0_38] : memref<4x9x9x4xf32, #tpu.memory_space<vmem>>, vector<1x8x8x4xf32>
    %30 = vector.shape_cast %29 : vector<1x8x8x4xf32> to vector<8x8x4xf32>
    %31 = vector.shape_cast %30 : vector<8x8x4xf32> to vector<64x4xf32>
    %c1_39 = arith.constant 1 : index
    %c1_40 = arith.constant 1 : index
    %c1_41 = arith.constant 1 : index
    %c0_42 = arith.constant 0 : index
    %32 = vector.load %arg12[%c1_39, %c1_40, %c1_41, %c0_42] : memref<4x9x9x4xf32, #tpu.memory_space<vmem>>, vector<1x8x8x4xf32>
    %33 = vector.shape_cast %32 : vector<1x8x8x4xf32> to vector<8x8x4xf32>
    %34 = vector.shape_cast %33 : vector<8x8x4xf32> to vector<64x4xf32>
    %c3_43 = arith.constant 3 : index
    %c1_44 = arith.constant 1 : index
    %c0_45 = arith.constant 0 : index
    %c0_46 = arith.constant 0 : index
    %35 = vector.load %arg12[%c3_43, %c1_44, %c0_45, %c0_46] : memref<4x9x9x4xf32, #tpu.memory_space<vmem>>, vector<1x8x8x4xf32>
    %36 = vector.shape_cast %35 : vector<1x8x8x4xf32> to vector<8x8x4xf32>
    %37 = vector.shape_cast %36 : vector<8x8x4xf32> to vector<64x4xf32>
    %c2_47 = arith.constant 2 : index
    %c1_48 = arith.constant 1 : index
    %c1_49 = arith.constant 1 : index
    %c0_50 = arith.constant 0 : index
    %38 = vector.load %arg12[%c2_47, %c1_48, %c1_49, %c0_50] : memref<4x9x9x4xf32, #tpu.memory_space<vmem>>, vector<1x8x8x4xf32>
    %39 = vector.shape_cast %38 : vector<1x8x8x4xf32> to vector<8x8x4xf32>
    %40 = vector.shape_cast %39 : vector<8x8x4xf32> to vector<64x4xf32>
    %c3_51 = arith.constant 3 : index
    %c1_52 = arith.constant 1 : index
    %c1_53 = arith.constant 1 : index
    %c0_54 = arith.constant 0 : index
    %41 = vector.load %arg12[%c3_51, %c1_52, %c1_53, %c0_54] : memref<4x9x9x4xf32, #tpu.memory_space<vmem>>, vector<1x8x8x4xf32>
    %42 = vector.shape_cast %41 : vector<1x8x8x4xf32> to vector<8x8x4xf32>
    %43 = vector.shape_cast %42 : vector<8x8x4xf32> to vector<64x4xf32>
    %44 = tpu.concatenate %19, %22, %25, %28, %31, %34, %37, %40, %43 in 1 : vector<64x4xf32>, vector<64x4xf32>, vector<64x4xf32>, vector<64x4xf32>, vector<64x4xf32>, vector<64x4xf32>, vector<64x4xf32>, vector<64x4xf32>, vector<64x4xf32> -> vector<64x36xf32>
    %45 = arith.truncf %44 : vector<64x36xf32> to vector<64x36xbf16>
    %c0_55 = arith.constant 0 : index
    %c0_56 = arith.constant 0 : index
    %46 = vector.load %arg4[%c0_55, %c0_56] : memref<36x8xbf16, #tpu.memory_space<vmem>>, vector<36x8xbf16>
    %cst_57 = arith.constant dense<0.000000e+00> : vector<64x8xf32>
    %47 = tpu.matmul %45, %46, %cst_57 {dimension_numbers = #tpu.dot_dimension_numbers<[1], [0], [0], [1], [0, 0, 1, 1], [], []>} : vector<64x36xbf16>, vector<36x8xbf16>, vector<64x8xf32> -> vector<64x8xf32>
    %48 = vector.shape_cast %47 : vector<64x8xf32> to vector<8x8x8xf32>
    %49 = arith.truncf %48 : vector<8x8x8xf32> to vector<8x8x8xbf16>
    %c0_58 = arith.constant 0 : index
    %c0_59 = arith.constant 0 : index
    %c0_60 = arith.constant 0 : index
    %c0_61 = arith.constant 0 : index
    %50 = vector.load %arg8[%c0_58, %c0_59, %c0_60, %c0_61] : memref<1x8x8x8xbf16, #tpu.memory_space<vmem>>, vector<1x8x8x8xbf16>
    %51 = vector.shape_cast %50 : vector<1x8x8x8xbf16> to vector<8x8x8xbf16>
    %52 = vector.shape_cast %49 : vector<8x8x8xbf16> to vector<1x8x8x8xbf16>
    tpu.vector_store %arg8[%c0_58, %c0_59, %c0_60, %c0_61], %52 {strides = array<i32>} : memref<1x8x8x8xbf16, #tpu.memory_space<vmem>>, vector<1x8x8x8xbf16>,
    %cst_62 = arith.constant dense<0.000000e+00> : vector<8xf32>
    %53 = vector.multi_reduction <add>, %47, %cst_62 [0] : vector<64x8xf32> to vector<8xf32>
    %54 = vector.shape_cast %53 : vector<8xf32> to vector<1x8xf32>
    %c0_63 = arith.constant 0 : index
    %c0_64 = arith.constant 0 : index
    %c0_65 = arith.constant 0 : index
    %55 = vector.load %arg9[%c0_63, %c0_64, %c0_65] : memref<1x1x8xf32, #tpu.memory_space<vmem>>, vector<1x1x8xf32>
    %56 = vector.shape_cast %55 : vector<1x1x8xf32> to vector<1x8xf32>
    %57 = vector.shape_cast %54 : vector<1x8xf32> to vector<1x1x8xf32>
    tpu.vector_store %arg9[%c0_63, %c0_64, %c0_65], %57 {strides = array<i32>} : memref<1x1x8xf32, #tpu.memory_space<vmem>>, vector<1x1x8xf32>,
    %58 = arith.mulf %47, %47 : vector<64x8xf32>
    %cst_66 = arith.constant dense<0.000000e+00> : vector<8xf32>
    %59 = vector.multi_reduction <add>, %58, %cst_66 [0] : vector<64x8xf32> to vector<8xf32>
    %60 = vector.shape_cast %59 : vector<8xf32> to vector<1x8xf32>
    %c0_67 = arith.constant 0 : index
    %c0_68 = arith.constant 0 : index
    %c0_69 = arith.constant 0 : index
    %61 = vector.load %arg10[%c0_67, %c0_68, %c0_69] : memref<1x1x8xf32, #tpu.memory_space<vmem>>, vector<1x1x8xf32>
    %62 = vector.shape_cast %61 : vector<1x1x8xf32> to vector<1x8xf32>
    %63 = vector.shape_cast %60 : vector<1x8xf32> to vector<1x1x8xf32>
    tpu.vector_store %arg10[%c0_67, %c0_68, %c0_69], %63 {strides = array<i32>} : memref<1x1x8xf32, #tpu.memory_space<vmem>>, vector<1x1x8xf32>,
    %64 = vector.extract_strided_slice %1 {offsets = [0, 0, 0, 0], sizes = [1, 8, 8, 4], strides = [1, 1, 1, 1]} : vector<4x8x8x4xf32> to vector<1x8x8x4xf32>
    %65 = vector.shape_cast %64 : vector<1x8x8x4xf32> to vector<8x8x4xf32>
    %c0_70 = arith.constant 0 : index
    %c0_71 = arith.constant 0 : index
    %66 = vector.load %arg5[%c0_70, %c0_71] : memref<1x4xf32, #tpu.memory_space<vmem>>, vector<1x4xf32>
    %67 = vector.shape_cast %66 : vector<1x4xf32> to vector<1x1x4xf32>
    %68 = vector.broadcast %67 : vector<1x1x4xf32> to vector<8x8x4xf32>
    %69 = arith.mulf %65, %68 : vector<8x8x4xf32>
    %c0_72 = arith.constant 0 : index
    %c0_73 = arith.constant 0 : index
    %70 = vector.load %arg6[%c0_72, %c0_73] : memref<1x4xf32, #tpu.memory_space<vmem>>, vector<1x4xf32>
    %71 = vector.shape_cast %70 : vector<1x4xf32> to vector<1x1x4xf32>
    %72 = vector.broadcast %71 : vector<1x1x4xf32> to vector<8x8x4xf32>
    %73 = arith.addf %69, %72 : vector<8x8x4xf32>
    %cst_74 = arith.constant 0.000000e+00 : f32
    %74 = vector.broadcast %cst_74 : f32 to vector<8x8x4xf32>
    %75 = arith.maximumf %73, %74 : vector<8x8x4xf32>
    %76 = vector.shape_cast %75 : vector<8x8x4xf32> to vector<64x4xf32>
    %77 = arith.truncf %76 : vector<64x4xf32> to vector<64x4xbf16>
    %c0_75 = arith.constant 0 : index
    %c0_76 = arith.constant 0 : index
    %78 = vector.load %arg7[%c0_75, %c0_76] : memref<4x8xbf16, #tpu.memory_space<vmem>>, vector<4x8xbf16>
    %cst_77 = arith.constant dense<0.000000e+00> : vector<64x8xf32>
    %79 = tpu.matmul %77, %78, %cst_77 {dimension_numbers = #tpu.dot_dimension_numbers<[1], [0], [0], [1], [0, 0, 1, 1], [], []>} : vector<64x4xbf16>, vector<4x8xbf16>, vector<64x8xf32> -> vector<64x8xf32>
    %80 = vector.shape_cast %79 : vector<64x8xf32> to vector<8x8x8xf32>
    %81 = arith.truncf %80 : vector<8x8x8xf32> to vector<8x8x8xbf16>
    %c0_78 = arith.constant 0 : index
    %c0_79 = arith.constant 0 : index
    %c0_80 = arith.constant 0 : index
    %c0_81 = arith.constant 0 : index
    %82 = vector.load %arg11[%c0_78, %c0_79, %c0_80, %c0_81] : memref<1x8x8x8xbf16, #tpu.memory_space<vmem>>, vector<1x8x8x8xbf16>
    %83 = vector.shape_cast %82 : vector<1x8x8x8xbf16> to vector<8x8x8xbf16>
    %84 = vector.shape_cast %81 : vector<8x8x8xbf16> to vector<1x8x8x8xbf16>
    tpu.vector_store %arg11[%c0_78, %c0_79, %c0_80, %c0_81], %84 {strides = array<i32>} : memref<1x8x8x8xbf16, #tpu.memory_space<vmem>>, vector<1x8x8x8xbf16>,
    return
  }
  func.func @transform_0(%arg0: i32) -> (i32, i32, i32, i32, i32) {
    %c0_i32 = arith.constant 0 : i32
    %c0_i32_0 = arith.constant 0 : i32
    %c0_i32_1 = arith.constant 0 : i32
    %c0_i32_2 = arith.constant 0 : i32
    %c0_i32_3 = arith.constant 0 : i32
    return %arg0, %c0_i32, %c0_i32_0, %c0_i32_1, %c0_i32_2 : i32, i32, i32, i32, i32
  }
  func.func @transform_1(%arg0: i32) -> (i32, i32) {
    %c0_i32 = arith.constant 0 : i32
    %c0_i32_0 = arith.constant 0 : i32
    %c0_i32_1 = arith.constant 0 : i32
    return %c0_i32, %c0_i32_0 : i32, i32
  }
  func.func @transform_2(%arg0: i32) -> (i32, i32) {
    %c0_i32 = arith.constant 0 : i32
    %c0_i32_0 = arith.constant 0 : i32
    %c0_i32_1 = arith.constant 0 : i32
    return %c0_i32, %c0_i32_0 : i32, i32
  }
  func.func @transform_3(%arg0: i32) -> (i32, i32) {
    %c0_i32 = arith.constant 0 : i32
    %c0_i32_0 = arith.constant 0 : i32
    %c0_i32_1 = arith.constant 0 : i32
    return %c0_i32, %c0_i32_0 : i32, i32
  }
  func.func @transform_4(%arg0: i32) -> (i32, i32) {
    %c0_i32 = arith.constant 0 : i32
    %c0_i32_0 = arith.constant 0 : i32
    %c0_i32_1 = arith.constant 0 : i32
    return %c0_i32, %c0_i32_0 : i32, i32
  }
  func.func @transform_5(%arg0: i32) -> (i32, i32) {
    %c0_i32 = arith.constant 0 : i32
    %c0_i32_0 = arith.constant 0 : i32
    %c0_i32_1 = arith.constant 0 : i32
    return %c0_i32, %c0_i32_0 : i32, i32
  }
  func.func @transform_6(%arg0: i32) -> (i32, i32) {
    %c0_i32 = arith.constant 0 : i32
    %c0_i32_0 = arith.constant 0 : i32
    %c0_i32_1 = arith.constant 0 : i32
    return %c0_i32, %c0_i32_0 : i32, i32
  }
  func.func @transform_7(%arg0: i32) -> (i32, i32, i32, i32) {
    %c0_i32 = arith.constant 0 : i32
    %c0_i32_0 = arith.constant 0 : i32
    %c0_i32_1 = arith.constant 0 : i32
    %c0_i32_2 = arith.constant 0 : i32
    return %arg0, %c0_i32, %c0_i32_0, %c0_i32_1 : i32, i32, i32, i32
  }
  func.func @transform_8(%arg0: i32) -> (i32, i32, i32) {
    %c0_i32 = arith.constant 0 : i32
    %c0_i32_0 = arith.constant 0 : i32
    %c0_i32_1 = arith.constant 0 : i32
    return %arg0, %c0_i32, %c0_i32_0 : i32, i32, i32
  }
  func.func @transform_9(%arg0: i32) -> (i32, i32, i32) {
    %c0_i32 = arith.constant 0 : i32
    %c0_i32_0 = arith.constant 0 : i32
    %c0_i32_1 = arith.constant 0 : i32
    return %arg0, %c0_i32, %c0_i32_0 : i32, i32, i32
  }
  func.func @transform_10(%arg0: i32) -> (i32, i32, i32, i32) {
    %c0_i32 = arith.constant 0 : i32
    %c0_i32_0 = arith.constant 0 : i32
    %c0_i32_1 = arith.constant 0 : i32
    %c0_i32_2 = arith.constant 0 : i32
    return %arg0, %c0_i32, %c0_i32_0, %c0_i32_1 : i32, i32, i32, i32
  }
}

module attributes {stable_mosaic.version = 11 : i64} {
  func.func @kernel(%arg0: i32, %arg1: memref<1x8x8x8xbf16, #tpu.memory_space<vmem>>, %arg2: memref<1x8xf32, #tpu.memory_space<vmem>>, %arg3: memref<1x8xf32, #tpu.memory_space<vmem>>, %arg4: memref<9x8x8xbf16, #tpu.memory_space<vmem>>, %arg5: memref<1x8x8x8xbf16, #tpu.memory_space<vmem>>, %arg6: memref<1x8x8x8xf32, #tpu.memory_space<vmem>>, %arg7: memref<10x10x8xf32, #tpu.memory_space<vmem>>) attributes {dimension_semantics = [#tpu.dimension_semantics<parallel>], iteration_bounds = array<i64: 2>, scalar_prefetch = 0 : i64, scratch_operands = 1 : i64, tpu.core_type = #tpu.core_type<tc>, window_params = [{transform_indices = @transform_0, window_bounds = array<i64: 1, 8, 8, 8>}, {pipeline_mode = #tpu.pipeline_mode<synchronous>, transform_indices = @transform_1, window_bounds = array<i64: 1, 8>}, {pipeline_mode = #tpu.pipeline_mode<synchronous>, transform_indices = @transform_2, window_bounds = array<i64: 1, 8>}, {pipeline_mode = #tpu.pipeline_mode<synchronous>, transform_indices = @transform_3, window_bounds = array<i64: 9, 8, 8>}, {transform_indices = @transform_4, window_bounds = array<i64: 1, 8, 8, 8>}, {transform_indices = @transform_5, window_bounds = array<i64: 1, 8, 8, 8>}]} {
    %c0 = arith.constant 0 : index
    %c0_0 = arith.constant 0 : index
    %c0_1 = arith.constant 0 : index
    %c0_2 = arith.constant 0 : index
    %0 = vector.load %arg1[%c0, %c0_0, %c0_1, %c0_2] : memref<1x8x8x8xbf16, #tpu.memory_space<vmem>>, vector<1x8x8x8xbf16>
    %1 = vector.shape_cast %0 : vector<1x8x8x8xbf16> to vector<8x8x8xbf16>
    %2 = arith.extf %1 : vector<8x8x8xbf16> to vector<8x8x8xf32>
    %c0_3 = arith.constant 0 : index
    %c0_4 = arith.constant 0 : index
    %3 = vector.load %arg2[%c0_3, %c0_4] : memref<1x8xf32, #tpu.memory_space<vmem>>, vector<1x8xf32>
    %4 = vector.shape_cast %3 : vector<1x8xf32> to vector<1x1x8xf32>
    %5 = vector.broadcast %4 : vector<1x1x8xf32> to vector<8x8x8xf32>
    %6 = arith.mulf %2, %5 : vector<8x8x8xf32>
    %c0_5 = arith.constant 0 : index
    %c0_6 = arith.constant 0 : index
    %7 = vector.load %arg3[%c0_5, %c0_6] : memref<1x8xf32, #tpu.memory_space<vmem>>, vector<1x8xf32>
    %8 = vector.shape_cast %7 : vector<1x8xf32> to vector<1x1x8xf32>
    %9 = vector.broadcast %8 : vector<1x1x8xf32> to vector<8x8x8xf32>
    %10 = arith.addf %6, %9 : vector<8x8x8xf32>
    %cst = arith.constant 0.000000e+00 : f32
    %11 = vector.broadcast %cst : f32 to vector<8x8x8xf32>
    %12 = arith.maximumf %10, %11 : vector<8x8x8xf32>
    %cst_7 = arith.constant 0.000000e+00 : f32
    %13 = vector.broadcast %cst_7 : f32 to vector<1x10x8xf32>
    %c0_8 = arith.constant 0 : index
    %c0_9 = arith.constant 0 : index
    %c0_10 = arith.constant 0 : index
    %14 = vector.load %arg7[%c0_8, %c0_9, %c0_10] : memref<10x10x8xf32, #tpu.memory_space<vmem>>, vector<1x10x8xf32>
    tpu.vector_store %arg7[%c0_8, %c0_9, %c0_10], %13 {strides = array<i32>} : memref<10x10x8xf32, #tpu.memory_space<vmem>>, vector<1x10x8xf32>,
    %cst_11 = arith.constant 0.000000e+00 : f32
    %15 = vector.broadcast %cst_11 : f32 to vector<1x10x8xf32>
    %c9 = arith.constant 9 : index
    %c0_12 = arith.constant 0 : index
    %c0_13 = arith.constant 0 : index
    %16 = vector.load %arg7[%c9, %c0_12, %c0_13] : memref<10x10x8xf32, #tpu.memory_space<vmem>>, vector<1x10x8xf32>
    tpu.vector_store %arg7[%c9, %c0_12, %c0_13], %15 {strides = array<i32>} : memref<10x10x8xf32, #tpu.memory_space<vmem>>, vector<1x10x8xf32>,
    %cst_14 = arith.constant 0.000000e+00 : f32
    %17 = vector.broadcast %cst_14 : f32 to vector<10x1x8xf32>
    %c0_15 = arith.constant 0 : index
    %c0_16 = arith.constant 0 : index
    %c0_17 = arith.constant 0 : index
    %18 = vector.load %arg7[%c0_15, %c0_16, %c0_17] : memref<10x10x8xf32, #tpu.memory_space<vmem>>, vector<10x1x8xf32>
    tpu.vector_store %arg7[%c0_15, %c0_16, %c0_17], %17 {strides = array<i32>} : memref<10x10x8xf32, #tpu.memory_space<vmem>>, vector<10x1x8xf32>,
    %cst_18 = arith.constant 0.000000e+00 : f32
    %19 = vector.broadcast %cst_18 : f32 to vector<10x1x8xf32>
    %c0_19 = arith.constant 0 : index
    %c9_20 = arith.constant 9 : index
    %c0_21 = arith.constant 0 : index
    %20 = vector.load %arg7[%c0_19, %c9_20, %c0_21] : memref<10x10x8xf32, #tpu.memory_space<vmem>>, vector<10x1x8xf32>
    tpu.vector_store %arg7[%c0_19, %c9_20, %c0_21], %19 {strides = array<i32>} : memref<10x10x8xf32, #tpu.memory_space<vmem>>, vector<10x1x8xf32>,
    %c1 = arith.constant 1 : index
    %c1_22 = arith.constant 1 : index
    %c0_23 = arith.constant 0 : index
    %21 = vector.load %arg7[%c1, %c1_22, %c0_23] : memref<10x10x8xf32, #tpu.memory_space<vmem>>, vector<8x8x8xf32>
    tpu.vector_store %arg7[%c1, %c1_22, %c0_23], %12 {strides = array<i32>} : memref<10x10x8xf32, #tpu.memory_space<vmem>>, vector<8x8x8xf32>,
    %cst_24 = arith.constant 0.000000e+00 : f32
    %22 = vector.broadcast %cst_24 : f32 to vector<64x8xf32>
    %c0_25 = arith.constant 0 : index
    %c0_26 = arith.constant 0 : index
    %c0_27 = arith.constant 0 : index
    %23 = vector.load %arg7[%c0_25, %c0_26, %c0_27] : memref<10x10x8xf32, #tpu.memory_space<vmem>>, vector<8x8x8xf32>
    %24 = vector.shape_cast %23 : vector<8x8x8xf32> to vector<64x8xf32>
    %25 = arith.truncf %24 : vector<64x8xf32> to vector<64x8xbf16>
    %c0_28 = arith.constant 0 : index
    %c0_29 = arith.constant 0 : index
    %c0_30 = arith.constant 0 : index
    %26 = vector.load %arg4[%c0_28, %c0_29, %c0_30] : memref<9x8x8xbf16, #tpu.memory_space<vmem>>, vector<1x8x8xbf16>
    %27 = vector.shape_cast %26 : vector<1x8x8xbf16> to vector<8x8xbf16>
    %cst_31 = arith.constant dense<0.000000e+00> : vector<64x8xf32>
    %28 = tpu.matmul %25, %27, %cst_31 {dimension_numbers = #tpu.dot_dimension_numbers<[1], [0], [0], [1], [0, 0, 1, 1], [], []>} : vector<64x8xbf16>, vector<8x8xbf16>, vector<64x8xf32> -> vector<64x8xf32>
    %29 = arith.addf %22, %28 : vector<64x8xf32>
    %c0_32 = arith.constant 0 : index
    %c1_33 = arith.constant 1 : index
    %c0_34 = arith.constant 0 : index
    %30 = vector.load %arg7[%c0_32, %c1_33, %c0_34] : memref<10x10x8xf32, #tpu.memory_space<vmem>>, vector<8x8x8xf32>
    %31 = vector.shape_cast %30 : vector<8x8x8xf32> to vector<64x8xf32>
    %32 = arith.truncf %31 : vector<64x8xf32> to vector<64x8xbf16>
    %c1_35 = arith.constant 1 : index
    %c0_36 = arith.constant 0 : index
    %c0_37 = arith.constant 0 : index
    %33 = vector.load %arg4[%c1_35, %c0_36, %c0_37] : memref<9x8x8xbf16, #tpu.memory_space<vmem>>, vector<1x8x8xbf16>
    %34 = vector.shape_cast %33 : vector<1x8x8xbf16> to vector<8x8xbf16>
    %cst_38 = arith.constant dense<0.000000e+00> : vector<64x8xf32>
    %35 = tpu.matmul %32, %34, %cst_38 {dimension_numbers = #tpu.dot_dimension_numbers<[1], [0], [0], [1], [0, 0, 1, 1], [], []>} : vector<64x8xbf16>, vector<8x8xbf16>, vector<64x8xf32> -> vector<64x8xf32>
    %36 = arith.addf %29, %35 : vector<64x8xf32>
    %c0_39 = arith.constant 0 : index
    %c2 = arith.constant 2 : index
    %c0_40 = arith.constant 0 : index
    %37 = vector.load %arg7[%c0_39, %c2, %c0_40] : memref<10x10x8xf32, #tpu.memory_space<vmem>>, vector<8x8x8xf32>
    %38 = vector.shape_cast %37 : vector<8x8x8xf32> to vector<64x8xf32>
    %39 = arith.truncf %38 : vector<64x8xf32> to vector<64x8xbf16>
    %c2_41 = arith.constant 2 : index
    %c0_42 = arith.constant 0 : index
    %c0_43 = arith.constant 0 : index
    %40 = vector.load %arg4[%c2_41, %c0_42, %c0_43] : memref<9x8x8xbf16, #tpu.memory_space<vmem>>, vector<1x8x8xbf16>
    %41 = vector.shape_cast %40 : vector<1x8x8xbf16> to vector<8x8xbf16>
    %cst_44 = arith.constant dense<0.000000e+00> : vector<64x8xf32>
    %42 = tpu.matmul %39, %41, %cst_44 {dimension_numbers = #tpu.dot_dimension_numbers<[1], [0], [0], [1], [0, 0, 1, 1], [], []>} : vector<64x8xbf16>, vector<8x8xbf16>, vector<64x8xf32> -> vector<64x8xf32>
    %43 = arith.addf %36, %42 : vector<64x8xf32>
    %c1_45 = arith.constant 1 : index
    %c0_46 = arith.constant 0 : index
    %c0_47 = arith.constant 0 : index
    %44 = vector.load %arg7[%c1_45, %c0_46, %c0_47] : memref<10x10x8xf32, #tpu.memory_space<vmem>>, vector<8x8x8xf32>
    %45 = vector.shape_cast %44 : vector<8x8x8xf32> to vector<64x8xf32>
    %46 = arith.truncf %45 : vector<64x8xf32> to vector<64x8xbf16>
    %c3 = arith.constant 3 : index
    %c0_48 = arith.constant 0 : index
    %c0_49 = arith.constant 0 : index
    %47 = vector.load %arg4[%c3, %c0_48, %c0_49] : memref<9x8x8xbf16, #tpu.memory_space<vmem>>, vector<1x8x8xbf16>
    %48 = vector.shape_cast %47 : vector<1x8x8xbf16> to vector<8x8xbf16>
    %cst_50 = arith.constant dense<0.000000e+00> : vector<64x8xf32>
    %49 = tpu.matmul %46, %48, %cst_50 {dimension_numbers = #tpu.dot_dimension_numbers<[1], [0], [0], [1], [0, 0, 1, 1], [], []>} : vector<64x8xbf16>, vector<8x8xbf16>, vector<64x8xf32> -> vector<64x8xf32>
    %50 = arith.addf %43, %49 : vector<64x8xf32>
    %c1_51 = arith.constant 1 : index
    %c1_52 = arith.constant 1 : index
    %c0_53 = arith.constant 0 : index
    %51 = vector.load %arg7[%c1_51, %c1_52, %c0_53] : memref<10x10x8xf32, #tpu.memory_space<vmem>>, vector<8x8x8xf32>
    %52 = vector.shape_cast %51 : vector<8x8x8xf32> to vector<64x8xf32>
    %53 = arith.truncf %52 : vector<64x8xf32> to vector<64x8xbf16>
    %c4 = arith.constant 4 : index
    %c0_54 = arith.constant 0 : index
    %c0_55 = arith.constant 0 : index
    %54 = vector.load %arg4[%c4, %c0_54, %c0_55] : memref<9x8x8xbf16, #tpu.memory_space<vmem>>, vector<1x8x8xbf16>
    %55 = vector.shape_cast %54 : vector<1x8x8xbf16> to vector<8x8xbf16>
    %cst_56 = arith.constant dense<0.000000e+00> : vector<64x8xf32>
    %56 = tpu.matmul %53, %55, %cst_56 {dimension_numbers = #tpu.dot_dimension_numbers<[1], [0], [0], [1], [0, 0, 1, 1], [], []>} : vector<64x8xbf16>, vector<8x8xbf16>, vector<64x8xf32> -> vector<64x8xf32>
    %57 = arith.addf %50, %56 : vector<64x8xf32>
    %c1_57 = arith.constant 1 : index
    %c2_58 = arith.constant 2 : index
    %c0_59 = arith.constant 0 : index
    %58 = vector.load %arg7[%c1_57, %c2_58, %c0_59] : memref<10x10x8xf32, #tpu.memory_space<vmem>>, vector<8x8x8xf32>
    %59 = vector.shape_cast %58 : vector<8x8x8xf32> to vector<64x8xf32>
    %60 = arith.truncf %59 : vector<64x8xf32> to vector<64x8xbf16>
    %c5 = arith.constant 5 : index
    %c0_60 = arith.constant 0 : index
    %c0_61 = arith.constant 0 : index
    %61 = vector.load %arg4[%c5, %c0_60, %c0_61] : memref<9x8x8xbf16, #tpu.memory_space<vmem>>, vector<1x8x8xbf16>
    %62 = vector.shape_cast %61 : vector<1x8x8xbf16> to vector<8x8xbf16>
    %cst_62 = arith.constant dense<0.000000e+00> : vector<64x8xf32>
    %63 = tpu.matmul %60, %62, %cst_62 {dimension_numbers = #tpu.dot_dimension_numbers<[1], [0], [0], [1], [0, 0, 1, 1], [], []>} : vector<64x8xbf16>, vector<8x8xbf16>, vector<64x8xf32> -> vector<64x8xf32>
    %64 = arith.addf %57, %63 : vector<64x8xf32>
    %c2_63 = arith.constant 2 : index
    %c0_64 = arith.constant 0 : index
    %c0_65 = arith.constant 0 : index
    %65 = vector.load %arg7[%c2_63, %c0_64, %c0_65] : memref<10x10x8xf32, #tpu.memory_space<vmem>>, vector<8x8x8xf32>
    %66 = vector.shape_cast %65 : vector<8x8x8xf32> to vector<64x8xf32>
    %67 = arith.truncf %66 : vector<64x8xf32> to vector<64x8xbf16>
    %c6 = arith.constant 6 : index
    %c0_66 = arith.constant 0 : index
    %c0_67 = arith.constant 0 : index
    %68 = vector.load %arg4[%c6, %c0_66, %c0_67] : memref<9x8x8xbf16, #tpu.memory_space<vmem>>, vector<1x8x8xbf16>
    %69 = vector.shape_cast %68 : vector<1x8x8xbf16> to vector<8x8xbf16>
    %cst_68 = arith.constant dense<0.000000e+00> : vector<64x8xf32>
    %70 = tpu.matmul %67, %69, %cst_68 {dimension_numbers = #tpu.dot_dimension_numbers<[1], [0], [0], [1], [0, 0, 1, 1], [], []>} : vector<64x8xbf16>, vector<8x8xbf16>, vector<64x8xf32> -> vector<64x8xf32>
    %71 = arith.addf %64, %70 : vector<64x8xf32>
    %c2_69 = arith.constant 2 : index
    %c1_70 = arith.constant 1 : index
    %c0_71 = arith.constant 0 : index
    %72 = vector.load %arg7[%c2_69, %c1_70, %c0_71] : memref<10x10x8xf32, #tpu.memory_space<vmem>>, vector<8x8x8xf32>
    %73 = vector.shape_cast %72 : vector<8x8x8xf32> to vector<64x8xf32>
    %74 = arith.truncf %73 : vector<64x8xf32> to vector<64x8xbf16>
    %c7 = arith.constant 7 : index
    %c0_72 = arith.constant 0 : index
    %c0_73 = arith.constant 0 : index
    %75 = vector.load %arg4[%c7, %c0_72, %c0_73] : memref<9x8x8xbf16, #tpu.memory_space<vmem>>, vector<1x8x8xbf16>
    %76 = vector.shape_cast %75 : vector<1x8x8xbf16> to vector<8x8xbf16>
    %cst_74 = arith.constant dense<0.000000e+00> : vector<64x8xf32>
    %77 = tpu.matmul %74, %76, %cst_74 {dimension_numbers = #tpu.dot_dimension_numbers<[1], [0], [0], [1], [0, 0, 1, 1], [], []>} : vector<64x8xbf16>, vector<8x8xbf16>, vector<64x8xf32> -> vector<64x8xf32>
    %78 = arith.addf %71, %77 : vector<64x8xf32>
    %c2_75 = arith.constant 2 : index
    %c2_76 = arith.constant 2 : index
    %c0_77 = arith.constant 0 : index
    %79 = vector.load %arg7[%c2_75, %c2_76, %c0_77] : memref<10x10x8xf32, #tpu.memory_space<vmem>>, vector<8x8x8xf32>
    %80 = vector.shape_cast %79 : vector<8x8x8xf32> to vector<64x8xf32>
    %81 = arith.truncf %80 : vector<64x8xf32> to vector<64x8xbf16>
    %c8 = arith.constant 8 : index
    %c0_78 = arith.constant 0 : index
    %c0_79 = arith.constant 0 : index
    %82 = vector.load %arg4[%c8, %c0_78, %c0_79] : memref<9x8x8xbf16, #tpu.memory_space<vmem>>, vector<1x8x8xbf16>
    %83 = vector.shape_cast %82 : vector<1x8x8xbf16> to vector<8x8xbf16>
    %cst_80 = arith.constant dense<0.000000e+00> : vector<64x8xf32>
    %84 = tpu.matmul %81, %83, %cst_80 {dimension_numbers = #tpu.dot_dimension_numbers<[1], [0], [0], [1], [0, 0, 1, 1], [], []>} : vector<64x8xbf16>, vector<8x8xbf16>, vector<64x8xf32> -> vector<64x8xf32>
    %85 = arith.addf %78, %84 : vector<64x8xf32>
    %86 = vector.shape_cast %85 : vector<64x8xf32> to vector<8x8x8xf32>
    %c0_81 = arith.constant 0 : index
    %c0_82 = arith.constant 0 : index
    %c0_83 = arith.constant 0 : index
    %c0_84 = arith.constant 0 : index
    %87 = vector.load %arg5[%c0_81, %c0_82, %c0_83, %c0_84] : memref<1x8x8x8xbf16, #tpu.memory_space<vmem>>, vector<1x8x8x8xbf16>
    %88 = vector.shape_cast %87 : vector<1x8x8x8xbf16> to vector<8x8x8xbf16>
    %89 = arith.extf %88 : vector<8x8x8xbf16> to vector<8x8x8xf32>
    %90 = arith.addf %86, %89 : vector<8x8x8xf32>
    %c0_85 = arith.constant 0 : index
    %c0_86 = arith.constant 0 : index
    %c0_87 = arith.constant 0 : index
    %c0_88 = arith.constant 0 : index
    %91 = vector.load %arg6[%c0_85, %c0_86, %c0_87, %c0_88] : memref<1x8x8x8xf32, #tpu.memory_space<vmem>>, vector<1x8x8x8xf32>
    %92 = vector.shape_cast %91 : vector<1x8x8x8xf32> to vector<8x8x8xf32>
    %93 = vector.shape_cast %90 : vector<8x8x8xf32> to vector<1x8x8x8xf32>
    tpu.vector_store %arg6[%c0_85, %c0_86, %c0_87, %c0_88], %93 {strides = array<i32>} : memref<1x8x8x8xf32, #tpu.memory_space<vmem>>, vector<1x8x8x8xf32>,
    return
  }
  func.func @transform_0(%arg0: i32) -> (i32, i32, i32, i32) {
    %c0_i32 = arith.constant 0 : i32
    %c0_i32_0 = arith.constant 0 : i32
    %c0_i32_1 = arith.constant 0 : i32
    %c0_i32_2 = arith.constant 0 : i32
    return %arg0, %c0_i32, %c0_i32_0, %c0_i32_1 : i32, i32, i32, i32
  }
  func.func @transform_1(%arg0: i32) -> (i32, i32) {
    %c0_i32 = arith.constant 0 : i32
    %c0_i32_0 = arith.constant 0 : i32
    %c0_i32_1 = arith.constant 0 : i32
    return %c0_i32, %c0_i32_0 : i32, i32
  }
  func.func @transform_2(%arg0: i32) -> (i32, i32) {
    %c0_i32 = arith.constant 0 : i32
    %c0_i32_0 = arith.constant 0 : i32
    %c0_i32_1 = arith.constant 0 : i32
    return %c0_i32, %c0_i32_0 : i32, i32
  }
  func.func @transform_3(%arg0: i32) -> (i32, i32, i32) {
    %c0_i32 = arith.constant 0 : i32
    %c0_i32_0 = arith.constant 0 : i32
    %c0_i32_1 = arith.constant 0 : i32
    %c0_i32_2 = arith.constant 0 : i32
    return %c0_i32, %c0_i32_0, %c0_i32_1 : i32, i32, i32
  }
  func.func @transform_4(%arg0: i32) -> (i32, i32, i32, i32) {
    %c0_i32 = arith.constant 0 : i32
    %c0_i32_0 = arith.constant 0 : i32
    %c0_i32_1 = arith.constant 0 : i32
    %c0_i32_2 = arith.constant 0 : i32
    return %arg0, %c0_i32, %c0_i32_0, %c0_i32_1 : i32, i32, i32, i32
  }
  func.func @transform_5(%arg0: i32) -> (i32, i32, i32, i32) {
    %c0_i32 = arith.constant 0 : i32
    %c0_i32_0 = arith.constant 0 : i32
    %c0_i32_1 = arith.constant 0 : i32
    %c0_i32_2 = arith.constant 0 : i32
    return %arg0, %c0_i32, %c0_i32_0, %c0_i32_1 : i32, i32, i32, i32
  }
}

</mosaic_0001>

<bundles_post_ra>
// kernel: _unnamed_function_.2
= control target key start
LH: loop header
LB: loop body
LE: loop exit
PB: predicated region body
PF: predicated region fallthrough
CT: control target
= control target key end

     0   :  { %s1789_s13 = smov 0   ;;  %s2266_s0 = inlined_call_operand.vmem [shape: f32[2,4,8,8,4], index: 0, kind: input, shape index: {}]   ;;  %s2267_s1 = inlined_call_operand.vmem [shape: f32[1,4], index: 1, kind: input, shape index: {}]   ;;  %s2268_s2 = inlined_call_operand.vmem [shape: f32[1,4], index: 2, kind: input, shape index: {}]   ;;  %s2269_s3 = inlined_call_operand.vmem [shape: bf16[36,8], index: 3, kind: input, shape index: {}]   ;;  %s2270_s4 = inlined_call_operand.vmem [shape: f32[1,4], index: 4, kind: input, shape index: {}]   ;;  %s2271_s5 = inlined_call_operand.vmem [shape: f32[1,4], index: 5, kind: input, shape index: {}]   ;;  %s2272_s6 = inlined_call_operand.vmem [shape: bf16[4,8], index: 6, kind: input, shape index: {}]   ;;  %s2273_s7 = inlined_call_operand.vmem [shape: bf16[2,8,8,8], index: 7, kind: output, shape index: {0}]   ;;  %s2274_s8 = inlined_call_operand.vmem [shape: f32[2,1,8], index: 8, kind: output, shape index: {1}]   ;;  %s2275_s9 = inlined_call_operand.vmem [shape: f32[2,1,8], index: 9, kind: output, shape index: {2}]   ;;  %s2276_s10 = inlined_call_operand.vmem [shape: bf16[2,8,8,8], index: 10, kind: output, shape index: {3}]  }
   0x1 LB: > { %s1468_s14 = sadd.s32 4294967295, %s1723_s13   ;;  %p1472_p0 = scmp.ge.s32.totalorder %s1723_s13, 1  ;;  %s1723_s13 = sphi %s1789_s13, %s21_s13  }
   0x2   : > { %p319_p1 = scmp.lt.s32.totalorder %s1723_s13, 3 }
   0x4   : > { %p320_p2 = pnand %p1472_p0, %p319_p1 }
   0x5   : > { %p368_p3 = scmp.lt.s32.totalorder (!%p320_p2), %s1468_s14, 1  ;;  %vm532_vm0 = vcmask (!%p320_p2), 31744   ;;  %vm534_vm1 = vcmask (!%p320_p2), 24576   ;;  %v1725_v0 = vmov (!%p320_p2), 0.0   ;;  %v1824_v1 = vld [vmem:[%s2267_s1] ss:$0 sm:$0xff] (!%p320_p2) }
   0x6   : > { %323 = sbr.rel (%p320_p2) target bundleno = 452 (0x1c4), region = 48  ;;  %540 = vst.msk [vmem:[#allocation2 + $0x1b0] sm:$0xff] (!%p320_p2), %vm532_vm0, %v1725_v0  ;;  %538 = vst.msk [vmem:[#allocation2 + $0x120] sm:$0xff] (!%p320_p2), %vm532_vm0, %v1725_v0  ;;  %v1834_v2 = vld [vmem:[%s2268_s2] ss:$0 sm:$0xff] (!%p320_p2)  ;;  %s1726_s23 = smov (!%p320_p2), 8  }
   0x7   : > { %541 = vst.msk [vmem:[#allocation2 + $0x1b8] sm:$0x1] (!%p320_p2), %vm534_vm1, %v1725_v0  ;;  %539 = vst.msk [vmem:[#allocation2 + $0x128] sm:$0x1] (!%p320_p2), %vm534_vm1, %v1725_v0  ;;  %s1727_s24 = smov (!%p320_p2), 4   ;;  %s1728_s25 = smov (!%p320_p2), 12  }
   0x8   : > { %552 = vst.msk [vmem:[#allocation2 + $0xa0] sm:$0x1] (!%p320_p2), %vm534_vm1, %v1725_v0  ;;  %553 = vst.msk [vmem:[#allocation2 + $0xb0] sm:$0x1] (!%p320_p2), %vm534_vm1, %v1725_v0  ;;  %s1729_s28 = smov (!%p320_p2), 16   ;;  %s1730_s11 = smov (!%p320_p2), 20  }
   0x9   : > { %554 = vst.msk [vmem:[#allocation2 + $0xc0] sm:$0x1] (!%p320_p2), %vm534_vm1, %v1725_v0  ;;  %555 = vst.msk [vmem:[#allocation2 + $0xd0] sm:$0x1] (!%p320_p2), %vm534_vm1, %v1725_v0  ;;  %vm1052_vm2 = vcmask (!%p320_p2), 1041408   ;;  %s1731_s16 = smov (!%p320_p2), 24  }
   0xa   : > { %556 = vst.msk [vmem:[#allocation2 + $0xe0] sm:$0x1] (!%p320_p2), %vm534_vm1, %v1725_v0  ;;  %557 = vst.msk [vmem:[#allocation2 + $0xf0] sm:$0x1] (!%p320_p2), %vm534_vm1, %v1725_v0  ;;  %s1732_s17 = smov (!%p320_p2), 28   ;;  %s1733_s18 = smov (!%p320_p2), 32  }
   0xb   : > { %558 = vst.msk [vmem:[#allocation2 + $0x100] sm:$0x1] (!%p320_p2), %vm534_vm1, %v1725_v0  ;;  %559 = vst.msk [vmem:[#allocation2 + $0x110] sm:$0x1] (!%p320_p2), %vm534_vm1, %v1725_v0  ;;  %vm952_vm3 = vcmask (!%p320_p2), 64512   ;;  %vm961_vm4 = vcmask (!%p320_p2), 97280  }
   0xc   : > { %570 = vst.msk [vmem:[#allocation2 + $0x1c0] sm:$0x1] (!%p320_p2), %vm534_vm1, %v1725_v0  ;;  %571 = vst.msk [vmem:[#allocation2 + $0x1d0] sm:$0x1] (!%p320_p2), %vm534_vm1, %v1725_v0  ;;  %vm970_vm5 = vcmask (!%p320_p2), 130048   ;;  %vm979_vm6 = vcmask (!%p320_p2), 162816  }
   0xd   : > { %s2278_s14 = smov (!%p368_p3, %s1468_s14), 1  ;;  %572 = vst.msk [vmem:[#allocation2 + $0x1e0] sm:$0x1] %vm534_vm1, %v1725_v0  ;;  %573 = vst.msk [vmem:[#allocation2 + $0x1f0] sm:$0x1] %vm534_vm1, %v1725_v0  ;;  %vm988_vm7 = vcmask 195584  }
   0xe   : > { %574 = vst.msk [vmem:[#allocation2 + $0x200] sm:$0x1] %vm534_vm1, %v1725_v0  ;;  %575 = vst.msk [vmem:[#allocation2 + $0x210] sm:$0x1] %vm534_vm1, %v1725_v0  ;;  %s1496_s15 = sshll.u32 %s2278_s14, 8  ;;  %vm997_vm8 = vcmask 228352   ;;  %s383_s19 = scalar_lea.vmem %s2275_s9, %s2278_s14 }
   0xf   : > { %576 = vst.msk [vmem:[#allocation2 + $0x220] sm:$0x1] %vm534_vm1, %v1725_v0  ;;  %577 = vst.msk [vmem:[#allocation2 + $0x230] sm:$0x1] %vm534_vm1, %v1725_v0  ;;  %s1829_s20 = scalar_lea.vmem %s2266_s0, %s1496_s15  ;;  %vm1006_vm9 = vcmask 261120   ;;  %vm1039_vm10 = vcmask 293888  }
  0x10   : > { %569 = vst.msk [vmem:[#allocation2 + $0x1b0] sm:$0x1] %vm534_vm1, %v1725_v0  ;;  %v414_v3 = vld [vmem:[%s1829_s20 + $0xc0] sm:$0xff]  ;;  %v415_v5 = vld [vmem:[%s1829_s20 + $0xc8] sm:$0xff]  ;;  %v416_v8 = vld [vmem:[%s1829_s20 + $0xd0] sm:$0xff]  ;;  %vm1129_vm11 = vcmask 60416  }
  0x11   : > { %v406_v4 = vld [vmem:[%s1829_s20 + $0x80] sm:$0xff]  ;;  %v453_v6 = vmul.f32 %v1824_v1, %v414_v3  ;;  %v454_v9 = vmul.f32 %v1824_v1, %v415_v5  ;;  %v407_v10 = vld [vmem:[%s1829_s20 + $0x88] sm:$0xff]  ;;  %v408_v11 = vld [vmem:[%s1829_s20 + $0x90] sm:$0xff]  ;;  %v455_v12 = vmul.f32 %v1824_v1, %v416_v8  ;;  %vm1159_vm12 = vcmask 57344  }
  0x12   : > { %v445_v7 = vmul.f32 %v1824_v1, %v406_v4  ;;  %v446_v13 = vmul.f32 %v1824_v1, %v407_v10  ;;  %v447_v14 = vmul.f32 %v1824_v1, %v408_v11  ;;  %v400_v15 = vld [vmem:[%s1829_s20 + $0x50] sm:$0xff]  ;;  %v401_v16 = vld [vmem:[%s1829_s20 + $0x58] sm:$0xff]  ;;  %v398_v25 = vld [vmem:[%s1829_s20 + $0x40] sm:$0xff] }
  0x13   : > { %v492_v17 = vadd.f32 %v1834_v2, %v453_v6  ;;  %v493_v19 = vadd.f32 %v1834_v2, %v454_v9  ;;  %v439_v20 = vmul.f32 %v1824_v1, %v400_v15  ;;  %v494_v21 = vadd.f32 %v1834_v2, %v455_v12  ;;  %v399_v26 = vld [vmem:[%s1829_s20 + $0x48] sm:$0xff]  ;;  %v1861_v27 = vld [vmem:[%s1829_s20 + $0x10] sm:$0xff]  ;;  %v1865_v32 = vld [vmem:[%s1829_s20 + $0x18] sm:$0xff] }
  0x14   : > { %v484_v18 = vadd.f32 %v1834_v2, %v445_v7  ;;  %v485_v22 = vadd.f32 %v1834_v2, %v446_v13  ;;  %v486_v23 = vadd.f32 %v1834_v2, %v447_v14  ;;  %v440_v24 = vmul.f32 %v1824_v1, %v401_v16  ;;  %v1868_v33 = vld [vmem:[%s1829_s20] sm:$0xff]  ;;  %v1871_v34 = vld [vmem:[%s1829_s20 + $0x8] sm:$0xff]  ;;  %v417_v39 = vld [vmem:[%s1829_s20 + $0xd8] sm:$0xff] }
  0x15   : > { %v524_v28 = vmax.f32 %v492_v17, 0.0  ;;  %v525_v30 = vmax.f32 %v493_v19, 0.0  ;;  %v478_v31 = vadd.f32 %v1834_v2, %v439_v20  ;;  %v526_v35 = vmax.f32 %v494_v21, 0.0  ;;  %v409_v44 = vld [vmem:[%s1829_s20 + $0x98] sm:$0xff]  ;;  %v410_v57 = vld [vmem:[%s1829_s20 + $0xa0] sm:$0xff]  ;;  %v411_v58 = vld [vmem:[%s1829_s20 + $0xa8] sm:$0xff] }
  0x16   : > { %v516_v29 = vmax.f32 %v484_v18, 0.0  ;;  %v517_v36 = vmax.f32 %v485_v22, 0.0  ;;  %v518_v37 = vmax.f32 %v486_v23, 0.0  ;;  %v479_v38 = vadd.f32 %v1834_v2, %v440_v24  ;;  %v412_v59 = vld [vmem:[%s1829_s20 + $0xb0] sm:$0xff]  ;;  %v419_v0 = vld [vmem:[%s1829_s20 + $0xe8] sm:$0xff]  ;;  %v418_v4 = vld [vmem:[%s1829_s20 + $0xe0] sm:$0xff] }
  0x17   : > { %603 = vst.msk [vmem:[#allocation2 + $0x1c1] sm:$0xff] %vm532_vm0, %v524_v28  ;;  %604 = vst.msk [vmem:[#allocation2 + $0x1d1] sm:$0xff] %vm532_vm0, %v525_v30  ;;  %v510_v40 = vmax.f32 %v478_v31, 0.0  ;;  %v437_v41 = vmul.f32 %v1824_v1, %v398_v25  ;;  %v438_v42 = vmul.f32 %v1824_v1, %v399_v26  ;;  %v431_v43 = vmul.f32 %v1824_v1, %v1861_v27  ;;  %v420_v3 = vld [vmem:[%s1829_s20 + $0xf0] sm:$0xff]  ;;  %v621_v6 = vld [vmem:[#allocation2 + $0x121] sm:$0xff] }
  0x18   : > { %595 = vst.msk [vmem:[#allocation2 + $0x131] sm:$0xff] %vm532_vm0, %v516_v29  ;;  %605 = vst.msk [vmem:[#allocation2 + $0x1e1] sm:$0xff] %vm532_vm0, %v526_v35  ;;  %v511_v45 = vmax.f32 %v479_v38, 0.0  ;;  %v432_v46 = vmul.f32 %v1824_v1, %v1865_v32  ;;  %v429_v47 = vmul.f32 %v1824_v1, %v1868_v33  ;;  %v430_v48 = vmul.f32 %v1824_v1, %v1871_v34  ;;  %v629_v5 = vld [vmem:[#allocation2 + $0x1b1] sm:$0xff] }
  0x19   : > { %596 = vst.msk [vmem:[#allocation2 + $0x141] sm:$0xff] %vm532_vm0, %v517_v36  ;;  %597 = vst.msk [vmem:[#allocation2 + $0x151] sm:$0xff] %vm532_vm0, %v518_v37  ;;  %v476_v49 = vadd.f32 %v1834_v2, %v437_v41  ;;  %v477_v50 = vadd.f32 %v1834_v2, %v438_v42  ;;  %v470_v51 = vadd.f32 %v1834_v2, %v431_v43  ;;  %v404_v36 = vld [vmem:[%s1829_s20 + $0x70] sm:$0xff]  ;;  %v405_v42 = vld [vmem:[%s1829_s20 + $0x78] sm:$0xff] }
  0x1a   : > { %589 = vst.msk [vmem:[#allocation2 + $0xc1] sm:$0xff] %vm532_vm0, %v510_v40  ;;  %v456_v52 = vmul.f32 %v1824_v1, %v417_v39  ;;  %590 = vst.msk [vmem:[#allocation2 + $0xd1] sm:$0xff] %vm532_vm0, %v511_v45  ;;  %v471_v53 = vadd.f32 %v1834_v2, %v432_v46  ;;  %v468_v54 = vadd.f32 %v1834_v2, %v429_v47  ;;  %v402_v43 = vld [vmem:[%s1829_s20 + $0x60] sm:$0xff]  ;;  %v403_v46 = vld [vmem:[%s1829_s20 + $0x68] sm:$0xff] }
  0x1b   : > { %v469_v55 = vadd.f32 %v1834_v2, %v430_v48  ;;  %v448_v56 = vmul.f32 %v1824_v1, %v409_v44  ;;  %v508_v60 = vmax.f32 %v476_v49, 0.0  ;;  %v509_v61 = vmax.f32 %v477_v50, 0.0  ;;  %v1955_v47 = vld [vmem:[%s1829_s20 + $0x30] sm:$0xff] }
  0x1c   : > { %v502_v62 = vmax.f32 %v470_v51, 0.0  ;;  %v495_v63 = vadd.f32 %v1834_v2, %v456_v52  ;;  %v503_v7 = vmax.f32 %v471_v53, 0.0  ;;  %v500_v8 = vmax.f32 %v468_v54, 0.0 }
  0x1d   : > { %v501_v9 = vmax.f32 %v469_v55, 0.0  ;;  %v487_v10 = vadd.f32 %v1834_v2, %v448_v56  ;;  %587 = vst.msk [vmem:[#allocation2 + $0xa1] sm:$0xff] %vm532_vm0, %v508_v60  ;;  %588 = vst.msk [vmem:[#allocation2 + $0xb1] sm:$0xff] %vm532_vm0, %v509_v61  ;;  %v449_v12 = vmul.f32 %v1824_v1, %v410_v57  ;;  %v450_v13 = vmul.f32 %v1824_v1, %v411_v58 }
  0x1e   : > { %581 = vst.msk [vmem:[#allocation2 + $0x31] sm:$0xff] %vm532_vm0, %v502_v62  ;;  %v527_v11 = vmax.f32 %v495_v63, 0.0  ;;  %v451_v14 = vmul.f32 %v1824_v1, %v412_v59  ;;  %v1916_v15 = vld [vmem:[#allocation2 + $0x1c1] sm:$0xff]  ;;  %v1920_v17 = vld [vmem:[#allocation2 + $0x1d1] sm:$0xff]  ;;  %582 = vst.msk [vmem:[#allocation2 + $0x41] sm:$0xff] %vm532_vm0, %v503_v7  ;;  %v458_v19 = vmul.f32 %v1824_v1, %v419_v0  ;;  %v459_v20 = vmul.f32 %v1824_v1, %v420_v3 }
  0x1f   : > { %v1918_v16 = vld [vmem:[#allocation2 + $0x131] sm:$0xff]  ;;  %579 = vst.msk [vmem:[#allocation2 + $0x11] sm:$0xff] %vm532_vm0, %v500_v8  ;;  %580 = vst.msk [vmem:[#allocation2 + $0x21] sm:$0xff] %vm532_vm0, %v501_v9  ;;  %v519_v18 = vmax.f32 %v487_v10, 0.0  ;;  %v457_v21 = vmul.f32 %v1824_v1, %v418_v4  ;;  %v1564_v22 = vpack.i.bf16 %v1916_v15, %v629_v5  ;;  %v1930_v24 = vld [vmem:[#allocation2 + $0x1e1] sm:$0xff]  ;;  %v488_v28 = vadd.f32 %v1834_v2, %v449_v12 }
  0x20   : > { %v1554_v23 = vpack.i.bf16 %v1918_v16, %v621_v6  ;;  %v1932_v25 = vld [vmem:[#allocation2 + $0x141] sm:$0xff]  ;;  %v1934_v26 = vld [vmem:[#allocation2 + $0x151] sm:$0xff]  ;;  %606 = vst.msk [vmem:[#allocation2 + $0x1f1] sm:$0xff] %vm532_vm0, %v527_v11  ;;  %v1569_v29 = vpack.i.bf16 %v1930_v24, %v1920_v17  ;;  %v489_v35 = vadd.f32 %v1834_v2, %v450_v13  ;;  %v490_v39 = vadd.f32 %v1834_v2, %v451_v14 }
  0x21   : > { %v1559_v30 = vpack.i.bf16 %v1934_v26, %v1932_v25  ;;  %v640_v31 = vld [vmem:[#allocation2 + $0xc0] sm:$0xff]  ;;  %598 = vst.msk [vmem:[#allocation2 + $0x161] sm:$0xff] %vm532_vm0, %v519_v18  ;;  %1565 = vrot.lane.b32.xlu1 %v1564_v22, %s1726_s23  ;;  %v641_v37 = vld [vmem:[#allocation2 + $0xd0] sm:$0xff]  ;;  %v520_v38 = vmax.f32 %v488_v28, 0.0  ;;  %v497_v40 = vadd.f32 %v1834_v2, %v458_v19  ;;  %v498_v41 = vadd.f32 %v1834_v2, %v459_v20  ;;  %v1974_v5 = vld [vmem:[%s1829_s20 + $0x38] sm:$0xff] }
  0x22   : > { %1555 = vrot.lane.b32.xlu0 %v1554_v23, %s1727_s24  ;;  %v521_v44 = vmax.f32 %v489_v35, 0.0  ;;  %v496_v45 = vadd.f32 %v1834_v2, %v457_v21  ;;  %v1579_v48 = vpack.i.bf16 %v641_v37, %v640_v31  ;;  %v522_v49 = vmax.f32 %v490_v39, 0.0  ;;  %v1977_v6 = vld [vmem:[%s1829_s20 + $0x20] sm:$0xff]  ;;  %v1982_v9 = vld [vmem:[%s1829_s20 + $0x28] sm:$0xff]  ;;  %v421_v10 = vld [vmem:[%s1829_s20 + $0xf8] sm:$0xff] }
  0x23   : > { %599 = vst.msk [vmem:[#allocation2 + $0x171] sm:$0xff] %vm532_vm0, %v520_v38  ;;  %v529_v50 = vmax.f32 %v497_v40, 0.0  ;;  %v530_v51 = vmax.f32 %v498_v41, 0.0  ;;  %v443_v56 = vmul.f32 %v1824_v1, %v404_v36  ;;  %v444_v57 = vmul.f32 %v1824_v1, %v405_v42  ;;  %v413_v11 = vld [vmem:[%s1829_s20 + $0xb8] sm:$0xff]  ;;  %v656_v19 = vld [vmem:[#allocation2 + $0xc1] sm:$0xff] }
  0x24   : > { %v638_v52 = vld [vmem:[#allocation2 + $0xa0] sm:$0xff]  ;;  %v639_v53 = vld [vmem:[#allocation2 + $0xb0] sm:$0xff]  ;;  %600 = vst.msk [vmem:[#allocation2 + $0x181] sm:$0xff] %vm532_vm0, %v521_v44  ;;  %v528_v55 = vmax.f32 %v496_v45, 0.0  ;;  %v441_v58 = vmul.f32 %v1824_v1, %v402_v43  ;;  %601 = vst.msk [vmem:[#allocation2 + $0x191] sm:$0xff] %vm532_vm0, %v522_v49  ;;  %v442_v63 = vmul.f32 %v1824_v1, %v403_v46  ;;  %v435_v0 = vmul.f32 %v1824_v1, %v1955_v47 }
  0x25   : > { %v648_v54 = vld [vmem:[#allocation2 + $0x31] sm:$0xff]  ;;  %1570 = vrot.lane.b32.xlu1 %v1569_v29, %s1726_s23  ;;  %v1574_v59 = vpack.i.bf16 %v639_v53, %v638_v52  ;;  %v649_v60 = vld [vmem:[#allocation2 + $0x41] sm:$0xff]  ;;  %608 = vst.msk [vmem:[#allocation2 + $0x211] sm:$0xff] %vm532_vm0, %v529_v50  ;;  %609 = vst.msk [vmem:[#allocation2 + $0x221] sm:$0xff] %vm532_vm0, %v530_v51  ;;  %v482_v3 = vadd.f32 %v1834_v2, %v443_v56  ;;  %v483_v4 = vadd.f32 %v1834_v2, %v444_v57 }
  0x26   : > { %1560 = vrot.lane.b32.xlu0 %v1559_v30, %s1727_s24  ;;  %v646_v61 = vld [vmem:[#allocation2 + $0x11] sm:$0xff]  ;;  %v647_v62 = vld [vmem:[#allocation2 + $0x21] sm:$0xff]  ;;  %607 = vst.msk [vmem:[#allocation2 + $0x201] sm:$0xff] %vm532_vm0, %v528_v55  ;;  %v480_v7 = vadd.f32 %v1834_v2, %v441_v58  ;;  %v481_v8 = vadd.f32 %v1834_v2, %v442_v63  ;;  %v1589_v12 = vpack.i.bf16 %v649_v60, %v648_v54 }
  0x27   : > { %v1584_v13 = vpack.i.bf16 %v647_v62, %v646_v61  ;;  %v514_v14 = vmax.f32 %v482_v3, 0.0  ;;  %v515_v18 = vmax.f32 %v483_v4, 0.0  ;;  %v436_v22 = vmul.f32 %v1824_v1, %v1974_v5  ;;  %v657_v28 = vld [vmem:[#allocation2 + $0xd1] sm:$0xff]  ;;  %v654_v29 = vld [vmem:[#allocation2 + $0xa1] sm:$0xff] }
  0x28   : > { %v512_v20 = vmax.f32 %v480_v7, 0.0  ;;  %v513_v21 = vmax.f32 %v481_v8, 0.0  ;;  %v474_v23 = vadd.f32 %v1834_v2, %v435_v0  ;;  %v655_v30 = vld [vmem:[#allocation2 + $0xb1] sm:$0xff]  ;;  %v433_v31 = vmul.f32 %v1824_v1, %v1977_v6  ;;  %v1714_v40 = vld [vmem:[%s2269_s3] sm:$0xff]   ;;  %v1715_v55 = vld [vmem:[%s2269_s3 + $0x8] sm:$0xff]  }
  0x29   : > { %1580 = vrot.lane.b32.xlu1 %v1579_v48, %s1728_s25  ;;  %593 = vst.msk [vmem:[#allocation2 + $0x101] sm:$0xff] %vm532_vm0, %v514_v14  ;;  %594 = vst.msk [vmem:[#allocation2 + $0x111] sm:$0xff] %vm532_vm0, %v515_v18  ;;  %v434_v35 = vmul.f32 %v1824_v1, %v1982_v9  ;;  %v460_v36 = vmul.f32 %v1824_v1, %v421_v10  ;;  %v452_v37 = vmul.f32 %v1824_v1, %v413_v11  ;;  %v2011_v46 = vld [vmem:[#allocation2 + $0x1e0] sm:$0xff]  ;;  %v2014_v49 = vld [vmem:[#allocation2 + $0x1f0] sm:$0xff] }
  0x2a   : > { %1575 = vrot.lane.b32.xlu0 %v1574_v59, %s1728_s25  ;;  %591 = vst.msk [vmem:[#allocation2 + $0xe1] sm:$0xff] %vm532_vm0, %v512_v20  ;;  %592 = vst.msk [vmem:[#allocation2 + $0xf1] sm:$0xff] %vm532_vm0, %v513_v21  ;;  %v475_v38 = vadd.f32 %v1834_v2, %v436_v22  ;;  %v506_v39 = vmax.f32 %v474_v23, 0.0  ;;  %v472_v41 = vadd.f32 %v1834_v2, %v433_v31  ;;  %v2016_v50 = vld [vmem:[#allocation2 + $0x1c0] sm:$0xff]  ;;  %v2018_v51 = vld [vmem:[#allocation2 + $0x1d0] sm:$0xff]  ;;  %1511 = vmatprep.subr.bf16.mxu0 %v1714_v40 }
  0x2b   : > { %v473_v42 = vadd.f32 %v1834_v2, %v434_v35  ;;  %v499_v43 = vadd.f32 %v1834_v2, %v460_v36  ;;  %v491_v44 = vadd.f32 %v1834_v2, %v452_v37  ;;  %v1599_v1 = vpack.i.bf16 %v657_v28, %v656_v19  ;;  %1512 = vmatpush3.bf16.msra.mxu0 %v1714_v40  ;;  %v675_v58 = vld [vmem:[#allocation2 + $0x161] sm:$0xff]  ;;  %v1716_v59 = vld [vmem:[%s2269_s3 + $0x10] ss:$0 sps:$4 sm:$0x33]   ;;  %v2043_v63 = vld [vmem:[#allocation2 + $0x171] sm:$0xff] }
  0x2c   : > { %v1594_v45 = vpack.i.bf16 %v655_v30, %v654_v29  ;;  %v507_v48 = vmax.f32 %v475_v38, 0.0  ;;  %585 = vst.msk [vmem:[#allocation2 + $0x71] sm:$0xff] %vm532_vm0, %v506_v39  ;;  %v504_v52 = vmax.f32 %v472_v41, 0.0  ;;  %v1609_v56 = vpack.i.bf16 %v2014_v49, %v2011_v46  ;;  %1513 = vmatprep.subr.bf16.mxu0 %v1715_v55  ;;  %v2051_v3 = vld [vmem:[#allocation2 + $0x181] sm:$0xff]  ;;  %v2060_v8 = vld [vmem:[#allocation2 + $0x211] sm:$0xff] }
  0x2d   : > { %1590 = vrot.lane.b32.xlu1 %v1589_v12, %s1729_s28  ;;  %v505_v2 = vmax.f32 %v473_v42, 0.0  ;;  %v531_v53 = vmax.f32 %v499_v43, 0.0  ;;  %v523_v54 = vmax.f32 %v491_v44, 0.0  ;;  %v1604_v57 = vpack.i.bf16 %v2018_v51, %v2016_v50  ;;  %v2062_v10 = vld [vmem:[#allocation2 + $0x221] sm:$0xff]  ;;  %v2081_v42 = vld [vmem:[#allocation2 + $0x210] sm:$0xff] }
  0x2e   : > { %1585 = vrot.lane.b32.xlu0 %v1584_v13, %s1729_s28  ;;  %586 = vst.msk [vmem:[#allocation2 + $0x81] sm:$0xff] %vm532_vm0, %v507_v48  ;;  %583 = vst.msk [vmem:[#allocation2 + $0x51] sm:$0xff] %vm532_vm0, %v504_v52  ;;  %v1619_v60 = vpack.i.bf16 %v675_v58, %v1934_v26  ;;  %v1614_v61 = vpack.i.bf16 %v1932_v25, %v1918_v16  ;;  %v1054_v62 = vsel %vm1052_vm2, %v1716_v59, 0  ;;  %v2053_v16 = vld [vmem:[#allocation2 + $0x191] sm:$0xff]  ;;  %v2077_v39 = vld [vmem:[#allocation2 + $0x220] sm:$0xff] }
  0x2f   : > { %584 = vst.msk [vmem:[#allocation2 + $0x61] sm:$0xff] %vm532_vm0, %v505_v2  ;;  %610 = vst.msk [vmem:[#allocation2 + $0x231] sm:$0xff] %vm532_vm0, %v531_v53  ;;  %1514 = vmatpush3.bf16.msra.mxu0 %v1715_v55  ;;  %v1629_v0 = vpack.i.bf16 %v2043_v63, %v675_v58  ;;  %v1624_v26 = vpack.i.bf16 %v1920_v17, %v1916_v15  ;;  %v683_v25 = vld [vmem:[#allocation2 + $0x1f1] sm:$0xff]  ;;  %v1639_v4 = vpack.i.bf16 %v2053_v16, %v2051_v3  ;;  %v2064_v15 = vld [vmem:[#allocation2 + $0x201] sm:$0xff] }
  0x30   : > { %602 = vst.msk [vmem:[#allocation2 + $0x1a1] sm:$0xff] %vm532_vm0, %v523_v54  ;;  %1535 = vmatprep.subr.msk.bf16.mxu0 %vm1052_vm2, %v1716_v59  ;;  %v1634_v7 = vpack.i.bf16 %v683_v25, %v1930_v24  ;;  %v1649_v17 = vpack.i.bf16 %v2062_v10, %v2060_v8  ;;  %v1644_v11 = vpack.i.bf16 %v2064_v15, %v683_v25  ;;  %v644_v12 = vld [vmem:[#allocation2 + $0x100] sm:$0xff]  ;;  %v645_v13 = vld [vmem:[#allocation2 + $0x110] sm:$0xff] }
  0x31   : > { %1600 = vrot.lane.b32.xlu1 %v1599_v1, %s1730_s11  ;;  %v642_v14 = vld [vmem:[#allocation2 + $0xe0] sm:$0xff]  ;;  %v643_v18 = vld [vmem:[#allocation2 + $0xf0] sm:$0xff]  ;;  %v1659_v24 = vpack.i.bf16 %v645_v13, %v644_v12  ;;  %v1704_v48 = vpack.i.bf16 %v2060_v8, %v2064_v15 }
  0x32   : > { %1595 = vrot.lane.b32.xlu0 %v1594_v45, %s1730_s11  ;;  %v1654_v19 = vpack.i.bf16 %v643_v18, %v642_v14  ;;  %v660_v30 = vld [vmem:[#allocation2 + $0x101] sm:$0xff]  ;;  %v661_v31 = vld [vmem:[#allocation2 + $0x111] sm:$0xff]  ;;  %v1694_v45 = vpack.i.bf16 %v2051_v3, %v2043_v63  ;;  %v1488_v52 = vld [vmem:[%s2270_s4] ss:$0 sm:$0xff] }
  0x33   : > { %1516 = vmatpush3.bf16.msra.mxu0 %v1054_v62  ;;  %v652_v20 = vld [vmem:[#allocation2 + $0x71] sm:$0xff]  ;;  %v658_v35 = vld [vmem:[#allocation2 + $0xe1] sm:$0xff]  ;;  %v1679_v37 = vpack.i.bf16 %v661_v31, %v660_v30  ;;  %v1198_v53 = vmul.f32 %v1488_v52, %v1868_v33  ;;  %v1199_v54 = vmul.f32 %v1488_v52, %v1871_v34  ;;  %v1200_v58 = vmul.f32 %v1488_v52, %v1861_v27 }
  0x34   : > { %v659_v36 = vld [vmem:[#allocation2 + $0xf1] sm:$0xff]  ;;  %v2079_v41 = vld [vmem:[#allocation2 + $0x200] sm:$0xff]  ;;  %v1201_v59 = vmul.f32 %v1488_v52, %v1865_v32  ;;  %v1204_v63 = vmul.f32 %v1488_v52, %v1955_v47 }
  0x35   : > { %1610 = vrot.lane.b32.xlu1 %v1609_v56, %s1731_s16  ;;  %v653_v21 = vld [vmem:[#allocation2 + $0x81] sm:$0xff]  ;;  %v650_v22 = vld [vmem:[#allocation2 + $0x51] sm:$0xff]  ;;  %v1674_v38 = vpack.i.bf16 %v659_v36, %v658_v35  ;;  %v1684_v44 = vpack.i.bf16 %v2081_v42, %v2079_v41 }
  0x36   : > { %1605 = vrot.lane.b32.xlu0 %v1604_v57, %s1731_s16  ;;  %v651_v23 = vld [vmem:[#allocation2 + $0x61] sm:$0xff]  ;;  %v1669_v28 = vpack.i.bf16 %v653_v21, %v652_v20  ;;  %v670_v40 = vld [vmem:[#allocation2 + $0x230] sm:$0xff]  ;;  %v1489_v57 = vld [vmem:[%s2271_s5] ss:$0 sm:$0xff] }
  0x37   : > { %v1664_v29 = vpack.i.bf16 %v651_v23, %v650_v22  ;;  %v1689_v43 = vpack.i.bf16 %v670_v40, %v2077_v39  ;;  %v679_v1 = vld [vmem:[#allocation2 + $0x1a1] sm:$0xff]  ;;  %v687_v55 = vld [vmem:[#allocation2 + $0x231] sm:$0xff]  ;;  %v1213_v34 = vadd.f32 %v1489_v57, %v1198_v53  ;;  %v1214_v62 = vadd.f32 %v1489_v57, %v1199_v54 }
  0x38   : > { %v1699_v2 = vpack.i.bf16 %v679_v1, %v2053_v16  ;;  %v1233_v56 = vld [vmem:[%s2272_s6] sm:$0x3]  ;;  %v1709_v27 = vpack.i.bf16 %v687_v55, %v2062_v10  ;;  %v1219_v15 = vadd.f32 %v1489_v57, %v1204_v63  ;;  %v612_v30 = vld [vmem:[#allocation2 + $0x1b0] sm:$0xff] }
  0x39   : > { %1620 = vrot.lane.b32.xlu1 %v1619_v60, %s1732_s17  ;;  %v1202_v60 = vmul.f32 %v1488_v52, %v1977_v6  ;;  %1536 = vmatprep.subr.msk.bf16.mxu1 %vm1052_vm2, %v1233_v56  ;;  %v1247_v33 = vsel %vm1052_vm2, %v1233_v56, 0  ;;  %v1221_v32 = vmax.f32 %v1213_v34, 0.0  ;;  %v1222_v6 = vmax.f32 %v1214_v62, 0.0 }
  0x3a   : > { %1615 = vrot.lane.b32.xlu0 %v1614_v61, %s1732_s17  ;;  %v1203_v61 = vmul.f32 %v1488_v52, %v1982_v9  ;;  %1526 = vmatpush3.bf16.msra.mxu1 %v1247_v33  ;;  %v1205_v9 = vmul.f32 %v1488_v52, %v1974_v5  ;;  %v1227_v10 = vmax.f32 %v1219_v15, 0.0 }
  0x3b   : > { %v1217_v3 = vadd.f32 %v1489_v57, %v1202_v60  ;;  %v1229_v47 = vpack.c.bf16 %v1222_v6, %v1221_v32 }
  0x3c   : > { %v1218_v16 = vadd.f32 %v1489_v57, %v1203_v61 }
  0x3d   : > { %1630 = vrot.lane.b32.xlu1 %v1629_v0, %s1727_s24  ;;  %v1215_v0 = vadd.f32 %v1489_v57, %v1200_v58  ;;  %1527 = vmatprep.mubr.msk.bf16.mxu1 %vm532_vm0, %v1229_v47 }
  0x3e   : > { %1625 = vrot.lane.b32.xlu0 %v1624_v26, %s1733_s18  ;;  %v1216_v26 = vadd.f32 %v1489_v57, %v1201_v59  ;;  %v1226_v8 = vmax.f32 %v1218_v16, 0.0 }
  0x3f   : > { %v1223_v25 = vmax.f32 %v1215_v0, 0.0 }
  0x41   : > { %1640 = vrot.lane.b32.xlu1 %v1639_v4, %s1727_s24  ;;  %v1224_v4 = vmax.f32 %v1216_v26, 0.0 }
  0x42   : > { %1635 = vrot.lane.b32.xlu0 %v1634_v7, %s1733_s18  ;;  %v1225_v7 = vmax.f32 %v1217_v3, 0.0 }
  0x44   : > { %v1231_v12 = vpack.c.bf16 %v1226_v8, %v1225_v7 }
  0x45   : > { %1650 = vrot.lane.b32.xlu1 %v1649_v17, %s1726_s23  ;;  %v1220_v17 = vadd.f32 %v1489_v57, %v1205_v9 }
  0x46   : > { %1645 = vrot.lane.b32.xlu0 %v1644_v11, %s1726_s23  ;;  %v1230_v11 = vpack.c.bf16 %v1224_v4, %v1223_v25 }
  0x47   : > { %v1228_v13 = vmax.f32 %v1220_v17, 0.0 }
  0x48   : > { %1528 = vmatmul.mubr.msk.bf16.vlgmr.msra.gmra.mrb[0].mxu1 %vm532_vm0, %v1230_v11 }
  0x49   : > { %1660 = vrot.lane.b32.xlu1 %v1659_v24, %s1728_s25  ;;  %1531 = vmatprep.mubr.msk.bf16.mxu1 %vm532_vm0, %v1231_v12  ;;  %v1232_v5 = vpack.c.bf16 %v1228_v13, %v1227_v10 }
  0x4a   : > { %1655 = vrot.lane.b32.xlu0 %v1654_v19, %s1728_s25  ;;  %s1497_s25 = sshll.u32 %s2278_s14, 5 }
  0x4d   : > { %1670 = vrot.lane.b32.xlu1 %v1669_v28, %s1729_s28 }
  0x4e   : > { %1665 = vrot.lane.b32.xlu0 %v1664_v29, %s1729_s28  ;;  %s388_s28 = scalar_lea.vmem %s2276_s10, %s1497_s25 }
  0x50   : > { %1532 = vmatmul.mubr.msk.bf16.gmra.mrb[4].mxu1 %vm532_vm0, %v1232_v5 }
  0x51   : > { %1680 = vrot.lane.b32.xlu1 %v1679_v37, %s1730_s11 }
  0x52   : > { %1675 = vrot.lane.b32.xlu0 %v1674_v38, %s1730_s11  ;;  %s2221_s11 = scalar_lea.vmem %s2273_s7, %s1497_s25 }
  0x55   : > { %1690 = vrot.lane.b32.xlu1 %v1689_v43, %s1731_s16 }
  0x56   : > { %1685 = vrot.lane.b32.xlu0 %v1684_v44, %s1731_s16  ;;  %s380_s16 = scalar_lea.vmem %s2274_s8, %s2278_s14 }
  0x59   : > { %1700 = vrot.lane.b32.xlu1 %v1699_v2, %s1732_s17 }
  0x5a   : > { %1695 = vrot.lane.b32.xlu0 %v1694_v45, %s1732_s17 }
  0x5d   : > { %1710 = vrot.lane.b32.xlu1 %v1709_v27, %s1733_s18 }
  0x5e   : > { %1705 = vrot.lane.b32.xlu0 %v1704_v48, %s1733_s18 }
  0x93   : > { %v1566_v14 = vpop.permute.xlu1 %1565 }
  0x94   : > { %v1556_v18 = vpop.permute.xlu0 %1555  ;;  %v1568_v38 = vunpack.i.h.bf16 %v1566_v14  ;;  %v1567_v40 = vunpack.i.l.bf16 %v1566_v14 }
  0x95   : > { %v1558_v28 = vunpack.i.h.bf16 %v1556_v18  ;;  %v1557_v29 = vunpack.i.l.bf16 %v1556_v18 }
  0x97   : > { %v1571_v24 = vpop.permute.xlu1 %1570  ;;  %v945_v43 = vsel %vm532_vm0, %v2016_v50, %v1558_v28  ;;  %v944_v44 = vsel %vm532_vm0, %v612_v30, %v1557_v29 }
  0x98   : > { %v1561_v19 = vpop.permute.xlu0 %1560  ;;  %v1573_v1 = vunpack.i.h.bf16 %v1571_v24  ;;  %v1572_v45 = vunpack.i.l.bf16 %v1571_v24  ;;  %v953_v50 = vsel %vm952_vm3, %v944_v44, %v1567_v40  ;;  %v954_v58 = vsel %vm952_vm3, %v945_v43, %v1568_v38 }
  0x99   : > { %v1563_v31 = vunpack.i.h.bf16 %v1561_v19  ;;  %v1562_v35 = vunpack.i.l.bf16 %v1561_v19 }
  0x9b   : > { %v1581_v20 = vpop.permute.xlu1 %1580  ;;  %v947_v48 = vsel %vm532_vm0, %v2011_v46, %v1563_v31  ;;  %v946_v52 = vsel %vm532_vm0, %v2018_v51, %v1562_v35 }
  0x9c   : > { %v1576_v21 = vpop.permute.xlu0 %1575  ;;  %v1583_v2 = vunpack.i.h.bf16 %v1581_v20  ;;  %v1582_v53 = vunpack.i.l.bf16 %v1581_v20  ;;  %v955_v59 = vsel %vm952_vm3, %v946_v52, %v1572_v45  ;;  %v956_v46 = vsel %vm952_vm3, %v947_v48, %v1573_v1 }
  0x9d   : > { %v1578_v56 = vunpack.i.h.bf16 %v1576_v21  ;;  %v1577_v57 = vunpack.i.l.bf16 %v1576_v21 }
  0x9e   : > { %v965_v61 = vsel %vm961_vm4, %v956_v46, %v1583_v2  ;;  %v964_v33 = vsel %vm961_vm4, %v955_v59, %v1582_v53 }
  0x9f   : > { %v2123_v22 = vpop.permute.xlu1 %1590  ;;  %v963_v26 = vsel %vm961_vm4, %v954_v58, %v1578_v56  ;;  %v962_v3 = vsel %vm961_vm4, %v953_v50, %v1577_v57 }
  0xa0   : > { %v1586_v23 = vpop.permute.xlu0 %1585  ;;  %v1593_v32 = vunpack.i.h.bf16 %v2123_v22  ;;  %v1592_v6 = vunpack.i.l.bf16 %v2123_v22 }
  0xa1   : > { %v1588_v60 = vunpack.i.h.bf16 %v1586_v23  ;;  %v1587_v51 = vunpack.i.l.bf16 %v1586_v23 }
  0xa2   : > { %v974_v23 = vsel %vm970_vm5, %v965_v61, %v1593_v32  ;;  %v973_v28 = vsel %vm970_vm5, %v964_v33, %v1592_v6 }
  0xa3   : > { %v2125_v36 = vpop.permute.xlu1 %1600  ;;  %v972_v4 = vsel %vm970_vm5, %v963_v26, %v1588_v60  ;;  %v971_v7 = vsel %vm970_vm5, %v962_v3, %v1587_v51 }
  0xa4   : > { %v1596_v37 = vpop.permute.xlu0 %1595  ;;  %v1603_v8 = vunpack.i.h.bf16 %v2125_v36  ;;  %v1602_v47 = vunpack.i.l.bf16 %v2125_v36 }
  0xa5   : > { %v1598_v34 = vunpack.i.h.bf16 %v1596_v37  ;;  %v1597_v62 = vunpack.i.l.bf16 %v1596_v37 }
  0xa6   : > { %v982_v31 = vsel %vm979_vm6, %v973_v28, %v1602_v47  ;;  %v983_v35 = vsel %vm979_vm6, %v974_v23, %v1603_v8 }
  0xa7   : > { %v1611_v54 = vpop.permute.xlu1 %1610  ;;  %v980_v15 = vsel %vm979_vm6, %v971_v7, %v1597_v62  ;;  %v981_v17 = vsel %vm979_vm6, %v972_v4, %v1598_v34 }
  0xa8   : > { %v1606_v55 = vpop.permute.xlu0 %1605  ;;  %v1613_v11 = vunpack.i.h.bf16 %v1611_v54  ;;  %v1612_v12 = vunpack.i.l.bf16 %v1611_v54 }
  0xa9   : > { %v1608_v16 = vunpack.i.h.bf16 %v1606_v55  ;;  %v1607_v27 = vunpack.i.l.bf16 %v1606_v55 }
  0xaa   : > { %v991_v40 = vsel %vm988_vm7, %v982_v31, %v1612_v12  ;;  %v992_v43 = vsel %vm988_vm7, %v983_v35, %v1613_v11 }
  0xab   : > { %v1621_v63 = vpop.permute.xlu1 %1620  ;;  %v989_v5 = vsel %vm988_vm7, %v980_v15, %v1607_v27  ;;  %v990_v14 = vsel %vm988_vm7, %v981_v17, %v1608_v16 }
  0xac   : > { %v1616_v0 = vpop.permute.xlu0 %1615  ;;  %v1623_v19 = vunpack.i.h.bf16 %v1621_v63  ;;  %v1622_v20 = vunpack.i.l.bf16 %v1621_v63 }
  0xad   : > { %v1618_v9 = vunpack.i.h.bf16 %v1616_v0  ;;  %v1617_v25 = vunpack.i.l.bf16 %v1616_v0 }
  0xae   : > { %v1000_v45 = vsel %vm997_vm8, %v991_v40, %v1622_v20  ;;  %v1001_v48 = vsel %vm997_vm8, %v992_v43, %v1623_v19 }
  0xaf   : > { %v1631_v10 = vpop.permute.xlu1 %1630  ;;  %v998_v21 = vsel %vm997_vm8, %v989_v5, %v1617_v25  ;;  %v999_v22 = vsel %vm997_vm8, %v990_v14, %v1618_v9 }
  0xb0   : > { %v1626_v13 = vpop.permute.xlu0 %1625  ;;  %v1633_v59 = vunpack.i.h.bf16 %v1631_v10  ;;  %v1632_v46 = vunpack.i.l.bf16 %v1631_v10 }
  0xb1   : > { %v1628_v18 = vunpack.i.h.bf16 %v1626_v13  ;;  %v1627_v24 = vunpack.i.l.bf16 %v1626_v13 }
  0xb2   : > { %v949_v32 = vsel %vm532_vm0, %v2079_v41, %v1633_v59  ;;  %v948_v6 = vsel %vm532_vm0, %v2014_v49, %v1632_v46 }
  0xb3   : > { %v1007_v29 = vsel %vm1006_vm9, %v998_v21, %v1627_v24  ;;  %v1008_v30 = vsel %vm1006_vm9, %v999_v22, %v1628_v18  ;;  %v1641_v36 = vpop.permute.xlu1 %1640 }
  0xb4   : > { %v1636_v37 = vpop.permute.xlu0 %1635  ;;  %v1015_v38 = vpack.c.bf16 %v1008_v30, %v1007_v29  ;;  %v1643_v60 = vunpack.i.h.bf16 %v1641_v36  ;;  %v1642_v51 = vunpack.i.l.bf16 %v1641_v36 }
  0xb5   : > { %v1638_v44 = vunpack.i.h.bf16 %v1636_v37  ;;  %v1637_v1 = vunpack.i.l.bf16 %v1636_v37 }
  0xb6   : > { %1517 = vmatprep.mubr.msk.bf16.mxu0 %vm1039_vm10, %v1015_v38  ;;  %v951_v9 = vsel %vm532_vm0, %v2077_v39, %v1643_v60  ;;  %v950_v25 = vsel %vm532_vm0, %v2081_v42, %v1642_v51 }
  0xb7   : > { %v1010_v52 = vsel %vm1006_vm9, %v1001_v48, %v1638_v44  ;;  %v1009_v2 = vsel %vm1006_vm9, %v1000_v45, %v1637_v1  ;;  %v1651_v54 = vpop.permute.xlu1 %1650 }
  0xb8   : > { %v1016_v53 = vpack.c.bf16 %v1010_v52, %v1009_v2  ;;  %v1646_v55 = vpop.permute.xlu0 %1645  ;;  %v1653_v61 = vunpack.i.h.bf16 %v1651_v54  ;;  %v1652_v33 = vunpack.i.l.bf16 %v1651_v54 }
  0xb9   : > { %v1648_v34 = vunpack.i.h.bf16 %v1646_v55  ;;  %v1647_v62 = vunpack.i.l.bf16 %v1646_v55 }
  0xba   : > { %1518 = vmatmul.mubr.msk.bf16.vlgmr.msra.gmra.mrb[0].mxu0 %vm1039_vm10, %v1016_v53  ;;  %v959_v4 = vsel %vm952_vm3, %v950_v25, %v1652_v33  ;;  %v960_v7 = vsel %vm952_vm3, %v951_v9, %v1653_v61 }
  0xbb   : > { %v1661_v56 = vpop.permute.xlu1 %1660  ;;  %v958_v8 = vsel %vm952_vm3, %v949_v32, %v1648_v34  ;;  %v957_v47 = vsel %vm952_vm3, %v948_v6, %v1647_v62 }
  0xbc   : > { %v1656_v57 = vpop.permute.xlu0 %1655  ;;  %v1663_v26 = vunpack.i.h.bf16 %v1661_v56  ;;  %v1662_v3 = vunpack.i.l.bf16 %v1661_v56 }
  0xbd   : > { %v1658_v16 = vunpack.i.h.bf16 %v1656_v57  ;;  %v1657_v27 = vunpack.i.l.bf16 %v1656_v57 }
  0xbe   : > { %v968_v10 = vsel %vm961_vm4, %v959_v4, %v1662_v3  ;;  %v969_v39 = vsel %vm961_vm4, %v960_v7, %v1663_v26 }
  0xbf   : > { %v1671_v50 = vpop.permute.xlu1 %1670  ;;  %v966_v42 = vsel %vm961_vm4, %v957_v47, %v1657_v27  ;;  %v967_v13 = vsel %vm961_vm4, %v958_v8, %v1658_v16 }
  0xc0   : > { %v1666_v58 = vpop.permute.xlu0 %1665  ;;  %v1673_v41 = vunpack.i.h.bf16 %v1671_v50  ;;  %v1672_v11 = vunpack.i.l.bf16 %v1671_v50 }
  0xc1   : > { %v1668_v12 = vunpack.i.h.bf16 %v1666_v58  ;;  %v1667_v49 = vunpack.i.l.bf16 %v1666_v58 }
  0xc2   : > { %v977_v29 = vsel %vm970_vm5, %v968_v10, %v1672_v11  ;;  %v978_v30 = vsel %vm970_vm5, %v969_v39, %v1673_v41 }
  0xc3   : > { %v1681_v63 = vpop.permute.xlu1 %1680  ;;  %v975_v31 = vsel %vm970_vm5, %v966_v42, %v1667_v49  ;;  %v976_v35 = vsel %vm970_vm5, %v967_v13, %v1668_v12 }
  0xc4   : > { %v1676_v0 = vpop.permute.xlu0 %1675  ;;  %v1683_v5 = vunpack.i.h.bf16 %v1681_v63  ;;  %v1682_v14 = vunpack.i.l.bf16 %v1681_v63 }
  0xc5   : > { %v1678_v18 = vunpack.i.h.bf16 %v1676_v0  ;;  %v1677_v24 = vunpack.i.l.bf16 %v1676_v0 }
  0xc6   : > { %v986_v43 = vsel %vm979_vm6, %v977_v29, %v1682_v14  ;;  %v987_v44 = vsel %vm979_vm6, %v978_v30, %v1683_v5 }
  0xc7   : > { %v1691_v15 = vpop.permute.xlu1 %1690  ;;  %v984_v1 = vsel %vm979_vm6, %v975_v31, %v1677_v24  ;;  %v985_v45 = vsel %vm979_vm6, %v976_v35, %v1678_v18 }
  0xc8   : > { %v1686_v17 = vpop.permute.xlu0 %1685  ;;  %v1693_v19 = vunpack.i.h.bf16 %v1691_v15  ;;  %v1692_v20 = vunpack.i.l.bf16 %v1691_v15 }
  0xc9   : > { %v1688_v21 = vunpack.i.h.bf16 %v1686_v17  ;;  %v1687_v22 = vunpack.i.l.bf16 %v1686_v17 }
  0xca   : > { %v995_v48 = vsel %vm988_vm7, %v986_v43, %v1692_v20  ;;  %v996_v52 = vsel %vm988_vm7, %v987_v44, %v1693_v19 }
  0xcb   : > { %v1701_v23 = vpop.permute.xlu1 %1700  ;;  %v993_v2 = vsel %vm988_vm7, %v984_v1, %v1687_v22  ;;  %v994_v53 = vsel %vm988_vm7, %v985_v45, %v1688_v21 }
  0xcc   : > { %v1696_v28 = vpop.permute.xlu0 %1695  ;;  %v1703_v36 = vunpack.i.h.bf16 %v1701_v23  ;;  %v1702_v37 = vunpack.i.l.bf16 %v1701_v23 }
  0xcd   : > { %v1698_v38 = vunpack.i.h.bf16 %v1696_v28  ;;  %v1697_v40 = vunpack.i.l.bf16 %v1696_v28 }
  0xce   : > { %v1004_v59 = vsel %vm997_vm8, %v995_v48, %v1702_v37  ;;  %v1005_v46 = vsel %vm997_vm8, %v996_v52, %v1703_v36 }
  0xcf   : > { %v1711_v54 = vpop.permute.xlu1 %1710  ;;  %v1002_v60 = vsel %vm997_vm8, %v993_v2, %v1697_v40  ;;  %v1003_v51 = vsel %vm997_vm8, %v994_v53, %v1698_v38 }
  0xd0   : > { %v1706_v55 = vpop.permute.xlu0 %1705  ;;  %v1713_v56 = vunpack.i.h.bf16 %v1711_v54  ;;  %v1712_v57 = vunpack.i.l.bf16 %v1711_v54 }
  0xd1   : > { %v1708_v50 = vunpack.i.h.bf16 %v1706_v55  ;;  %v1707_v58 = vunpack.i.l.bf16 %v1706_v55 }
  0xd2   : > { %v1013_v61 = vsel %vm1006_vm9, %v1004_v59, %v1712_v57  ;;  %v1014_v33 = vsel %vm1006_vm9, %v1005_v46, %v1713_v56 }
  0xd3   : > { %v1011_v34 = vsel %vm1006_vm9, %v1002_v60, %v1707_v58  ;;  %v1012_v62 = vsel %vm1006_vm9, %v1003_v51, %v1708_v50  ;;  %v1018_v63 = vpack.c.bf16 %v1014_v33, %v1013_v61 }
  0xd4   : > { %v1017_v0 = vpack.c.bf16 %v1012_v62, %v1011_v34 }
  0xd6   : > { %1521 = vmatprep.mubr.msk.bf16.mxu0 %vm1039_vm10, %v1017_v0 }
  0xd7   : > { %1522 = vmatmul.mubr.msk.bf16.gmra.mrb[4].mxu0 %vm1039_vm10, %v1018_v63 }
 0x11b   : > { %v1529_v26 = vpop.f32.mrb[0].mxu1 }
 0x11c   : > { %v1283_v3 = vpop.f32.mrb[1].mxu1  ;;  %v1316_v32 = vpack.c.bf16 %v1529_v26, %v1529_v26 }
 0x11d   : > { %v1530_v16 = vpop.f32.mrb[2].mxu1  ;;  %v1314_v6 = vpack.c.bf16 %v1283_v3, %v1283_v3 }
 0x11e   : > { %v1286_v27 = vpop.f32.mrb[3].mxu1  ;;  %v1317_v9 = vpack.c.bf16 %v1530_v16, %v1530_v16  ;;  %1324 = vst.msk [vmem:[%s388_s28 + $0x8] sm:$0xf] %vm1129_vm11, %v1316_v32 }
 0x11f   : > { %v1315_v25 = vpack.c.bf16 %v1286_v27, %v1286_v27  ;;  %1322 = vst.msk [vmem:[%s388_s28] sm:$0xf] %vm1129_vm11, %v1314_v6 }
 0x120   : > { %1325 = vst.msk [vmem:[%s388_s28 + $0xc] sm:$0xf] %vm1129_vm11, %v1317_v9 }
 0x121   : > { %1323 = vst.msk [vmem:[%s388_s28 + $0x4] sm:$0xf] %vm1129_vm11, %v1315_v25 }
 0x123   : > { %v1533_v4 = vpop.f32.mrb[4].mxu1 }
 0x124   : > { %v1299_v7 = vpop.f32.mrb[5].mxu1  ;;  %v1320_v15 = vpack.c.bf16 %v1533_v4, %v1533_v4 }
 0x125   : > { %v1534_v8 = vpop.f32.mrb[6].mxu1  ;;  %v1318_v17 = vpack.c.bf16 %v1299_v7, %v1299_v7 }
 0x126   : > { %v1302_v47 = vpop.f32.mrb[7].mxu1  ;;  %v1321_v41 = vpack.c.bf16 %v1534_v8, %v1534_v8  ;;  %1328 = vst.msk [vmem:[%s388_s28 + $0x18] sm:$0xf] %vm1129_vm11, %v1320_v15 }
 0x127   : > { %v1319_v11 = vpack.c.bf16 %v1302_v47, %v1302_v47  ;;  %1326 = vst.msk [vmem:[%s388_s28 + $0x10] sm:$0xf] %vm1129_vm11, %v1318_v17 }
 0x128   : > { %1329 = vst.msk [vmem:[%s388_s28 + $0x1c] sm:$0xf] %vm1129_vm11, %v1321_v41 }
 0x129   : > { %1327 = vst.msk [vmem:[%s388_s28 + $0x14] sm:$0xf] %vm1129_vm11, %v1319_v11 }
 0x18d   : > { %v1519_v12 = vpop.f32.mrb[0].mxu0 }
 0x18e   : > { %v1123_v49 = vpack.c.bf16 %v1519_v12, %v1519_v12  ;;  %v1090_v10 = vpop.f32.mrb[1].mxu0  ;;  %v1163_v5 = vmul.f32 %v1519_v12, %v1519_v12  ;;  %v1141_v23 = vsel %vm952_vm3, %v1519_v12, 0.0 }
 0x18f   : > { %v1121_v39 = vpack.c.bf16 %v1090_v10, %v1090_v10  ;;  %v1161_v42 = vmul.f32 %v1090_v10, %v1090_v10  ;;  %v1520_v13 = vpop.f32.mrb[2].mxu0  ;;  %v1138_v24 = vsel %vm952_vm3, %v1090_v10, 0.0 }
 0x190   : > { %1132 = vst.msk [vmem:[%s2221_s11 + $0x8] sm:$0xf] %vm1129_vm11, %v1123_v49  ;;  %v1124_v14 = vpack.c.bf16 %v1520_v13, %v1520_v13  ;;  %v1093_v18 = vpop.f32.mrb[3].mxu0  ;;  %v1164_v29 = vmul.f32 %v1520_v13, %v1520_v13  ;;  %v1172_v36 = vsel %vm952_vm3, %v1163_v5, 0.0  ;;  %v1143_v37 = vsel %vm952_vm3, %v1520_v13, 0.0 }
 0x191   : > { %1130 = vst.msk [vmem:[%s2221_s11] sm:$0xf] %vm1129_vm11, %v1121_v39  ;;  %v1122_v19 = vpack.c.bf16 %v1093_v18, %v1093_v18  ;;  %v1139_v20 = vsel %vm952_vm3, %v1093_v18, 0.0  ;;  %v1162_v21 = vmul.f32 %v1093_v18, %v1093_v18  ;;  %v1169_v28 = vsel %vm952_vm3, %v1161_v42, 0.0 }
 0x192   : > { %1133 = vst.msk [vmem:[%s2221_s11 + $0xc] sm:$0xf] %vm1129_vm11, %v1124_v14  ;;  %v1140_v22 = vadd.f32 %v1139_v20, %v1138_v24  ;;  %v1174_v43 = vsel %vm952_vm3, %v1164_v29, 0.0 }
 0x193   : > { %1131 = vst.msk [vmem:[%s2221_s11 + $0x4] sm:$0xf] %vm1129_vm11, %v1122_v19  ;;  %v1170_v30 = vsel %vm952_vm3, %v1162_v21, 0.0 }
 0x194   : > { %v1142_v31 = vadd.f32 %v1141_v23, %v1140_v22  ;;  %v1171_v35 = vadd.f32 %v1170_v30, %v1169_v28 }
 0x196   : > { %v1173_v38 = vadd.f32 %v1172_v36, %v1171_v35  ;;  %v1144_v40 = vadd.f32 %v1143_v37, %v1142_v31 }
 0x198   : > { %v1175_v44 = vadd.f32 %v1174_v43, %v1173_v38 }
 0x1aa   : > { %v1523_v1 = vpop.f32.mrb[4].mxu0 }
 0x1ab   : > { %v1127_v45 = vpack.c.bf16 %v1523_v1, %v1523_v1  ;;  %v1106_v48 = vpop.f32.mrb[5].mxu0  ;;  %v1167_v46 = vmul.f32 %v1523_v1, %v1523_v1  ;;  %v1149_v33 = vsel %vm952_vm3, %v1523_v1, 0.0 }
 0x1ac   : > { %v1125_v52 = vpack.c.bf16 %v1106_v48, %v1106_v48  ;;  %v1145_v2 = vsel %vm952_vm3, %v1106_v48, 0.0  ;;  %v1165_v53 = vmul.f32 %v1106_v48, %v1106_v48  ;;  %v1524_v54 = vpop.f32.mrb[6].mxu0 }
 0x1ad   : > { %1136 = vst.msk [vmem:[%s2221_s11 + $0x18] sm:$0xf] %vm1129_vm11, %v1127_v45  ;;  %v1146_v55 = vadd.f32 %v1145_v2, %v1144_v40  ;;  %v1128_v56 = vpack.c.bf16 %v1524_v54, %v1524_v54  ;;  %v1109_v57 = vpop.f32.mrb[7].mxu0  ;;  %v1168_v34 = vmul.f32 %v1524_v54, %v1524_v54  ;;  %v1151_v0 = vsel %vm952_vm3, %v1524_v54, 0.0 }
 0x1ae   : > { %1134 = vst.msk [vmem:[%s2221_s11 + $0x10] sm:$0xf] %vm1129_vm11, %v1125_v52  ;;  %v1176_v50 = vsel %vm952_vm3, %v1165_v53, 0.0  ;;  %v1126_v58 = vpack.c.bf16 %v1109_v57, %v1109_v57  ;;  %v1147_v59 = vsel %vm952_vm3, %v1109_v57, 0.0  ;;  %v1166_v61 = vmul.f32 %v1109_v57, %v1109_v57 }
 0x1af   : > { %v1177_v60 = vadd.f32 %v1176_v50, %v1175_v44  ;;  %1137 = vst.msk [vmem:[%s2221_s11 + $0x1c] sm:$0xf] %vm1129_vm11, %v1128_v56  ;;  %v1148_v51 = vadd.f32 %v1147_v59, %v1146_v55  ;;  %v1180_v3 = vsel %vm952_vm3, %v1167_v46, 0.0  ;;  %v1182_v32 = vsel %vm952_vm3, %v1168_v34, 0.0 }
 0x1b0   : > { %1135 = vst.msk [vmem:[%s2221_s11 + $0x14] sm:$0xf] %vm1129_vm11, %v1126_v58  ;;  %v1178_v63 = vsel %vm952_vm3, %v1166_v61, 0.0 }
 0x1b1   : > { %v1150_v62 = vadd.f32 %v1149_v33, %v1148_v51  ;;  %v1179_v26 = vadd.f32 %v1178_v63, %v1177_v60 }
 0x1b3   : > { %v1152_v16 = vadd.f32 %v1151_v0, %v1150_v62  ;;  %v1181_v27 = vadd.f32 %v1180_v3, %v1179_v26 }
 0x1b5   : > { %v1153_v6 = vrot.slane %v1152_v16, 4  ;;  %v1183_v9 = vadd.f32 %v1182_v32, %v1181_v27 }
 0x1b7   : > { %v1154_v25 = vadd.f32 %v1153_v6, %v1152_v16  ;;  %v1184_v4 = vrot.slane %v1183_v9, 4 }
 0x1b9   : > { %v1155_v7 = vrot.slane %v1154_v25, 2  ;;  %v1185_v8 = vadd.f32 %v1184_v4, %v1183_v9 }
 0x1bb   : > { %v1156_v47 = vadd.f32 %v1155_v7, %v1154_v25  ;;  %v1186_v15 = vrot.slane %v1185_v8, 2 }
 0x1bd   : > { %v1157_v17 = vrot.slane %v1156_v47, 1  ;;  %v1187_v41 = vadd.f32 %v1186_v15, %v1185_v8 }
 0x1bf   : > { %v1158_v11 = vadd.f32 %v1157_v17, %v1156_v47  ;;  %v1188_v12 = vrot.slane %v1187_v41, 1 }
 0x1c1   : > { %1160 = vst.msk [vmem:[%s380_s16] sm:$0x1] %vm1159_vm12, %v1158_v11  ;;  %v1189_v49 = vadd.f32 %v1188_v12, %v1187_v41 }
 0x1c3   : > { %1190 = vst.msk [vmem:[%s383_s19] sm:$0x1] %vm1159_vm12, %v1189_v49 }
 0x1c4 PF: > { %s21_s13 = sadd.s32 1, %s1723_s13  }
 0x1c5   : > { %p18_p4 = scmp.ge.s32.totalorder %s21_s13, 4  }
 0x1c7   :  { %20 = sbr.rel (!%p18_p4) target bundleno = 1 (0x1), region = 120 }

// kernel: _unnamed_function_.3
= control target key start
LH: loop header
LB: loop body
LE: loop exit
PB: predicated region body
PF: predicated region fallthrough
CT: control target
= control target key end

     0   :  { %s1698_s18 = smov 0   ;;  %s1911_s0 = inlined_call_operand.vmem [shape: bf16[2,8,8,8], index: 0, kind: input, shape index: {}]   ;;  %s1912_s1 = inlined_call_operand.vmem [shape: f32[1,8], index: 1, kind: input, shape index: {}]   ;;  %s1913_s2 = inlined_call_operand.vmem [shape: f32[1,8], index: 2, kind: input, shape index: {}]   ;;  %s1914_s3 = inlined_call_operand.vmem [shape: bf16[9,8,8], index: 3, kind: input, shape index: {}]   ;;  %s1915_s4 = inlined_call_operand.vmem [shape: bf16[2,8,8,8], index: 4, kind: input, shape index: {}]   ;;  %s1916_s5 = inlined_call_operand.vmem [shape: f32[2,8,8,8], index: 5, kind: output, shape index: {}]  }
   0x1 LB: > { %s1339_s19 = sadd.s32 4294967295, %s1665_s18   ;;  %p1343_p0 = scmp.ge.s32.totalorder %s1665_s18, 1  ;;  %s1665_s18 = sphi %s1698_s18, %s15_s18  }
   0x2   : > { %p197_p1 = scmp.lt.s32.totalorder %s1665_s18, 3 }
   0x4   : > { %p198_p2 = pnand %p1343_p0, %p197_p1 }
   0x5   : > { %v1352_v0 = vld [vmem:[%s1914_s3 + $0x4] sm:$0xf] (!%p198_p2)  ;;  %vm376_vm0 = vcmask (!%p198_p2), 1043456   ;;  %v1712_v1 = vld [vmem:[%s1914_s3 + $0x10] sm:$0xf] (!%p198_p2)  ;;  %p230_p3 = scmp.lt.s32.totalorder (!%p198_p2), %s1339_s19, 1 }
   0x6   : > { %201 = sbr.rel (%p198_p2) target bundleno = 324 (0x144), region = 40  ;;  %1640 = vmatprep.subr.msk.bf16.mxu1 (!%p198_p2), %vm376_vm0, %v1352_v0  ;;  %1644 = vmatprep.subr.msk.bf16.mxu0 (!%p198_p2), %vm376_vm0, %v1712_v1  ;;  %v378_v2 = vsel (!%p198_p2), %vm376_vm0, %v1352_v0, 0  ;;  %v1720_v3 = vsel (!%p198_p2), %vm376_vm0, %v1712_v1, 0  ;;  %vm300_vm1 = vcmask (!%p198_p2), 64512   ;;  %vm302_vm2 = vcmask (!%p198_p2), 58368  }
   0x7   : > { %1485 = vmatpush3.bf16.msra.mxu1 (!%p198_p2), %v378_v2  ;;  %1525 = vmatpush3.bf16.msra.mxu0 (!%p198_p2), %v1720_v3  ;;  %vm307_vm3 = vcmask (!%p198_p2), 57344   ;;  %v1667_v4 = vmov (!%p198_p2), 0.0   ;;  %v1746_v5 = vld [vmem:[%s1914_s3] sm:$0xf] (!%p198_p2)  ;;  %v1751_v6 = vld [vmem:[%s1914_s3 + $0x14] sm:$0xf] (!%p198_p2) }
   0x8   : > { %301 = vst.msk [vmem:[#allocation2] sm:$0xff] (!%p198_p2), %vm300_vm1, %v1667_v4  ;;  %305 = vst.msk [vmem:[#allocation2 + $0x90] sm:$0xff] (!%p198_p2), %vm300_vm1, %v1667_v4  ;;  %1641 = vmatprep.subr.msk.bf16.mxu1 (!%p198_p2), %vm376_vm0, %v1746_v5  ;;  %1646 = vmatprep.subr.msk.bf16.mxu0 (!%p198_p2), %vm376_vm0, %v1751_v6  ;;  %v1350_v7 = vld [vmem:[%s1912_s1] ss:$0 sm:$0xff] (!%p198_p2)  ;;  %v458_v54 = vsel (!%p198_p2), %vm376_vm0, %v1746_v5, 0  ;;  %v858_v56 = vsel (!%p198_p2), %vm376_vm0, %v1751_v6, 0 }
   0x9   : > { %303 = vst.msk [vmem:[#allocation2 + $0x8] sm:$0x3] (!%p198_p2), %vm302_vm2, %v1667_v4  ;;  %306 = vst.msk [vmem:[#allocation2 + $0x98] sm:$0x3] (!%p198_p2), %vm302_vm2, %v1667_v4  ;;  %v1351_v16 = vld [vmem:[%s1913_s2] ss:$0 sm:$0xff] (!%p198_p2) }
   0xa   : > { %309 = vst.msk [vmem:[#allocation2 + $0x10] sm:$0x1] (!%p198_p2), %vm307_vm3, %v1667_v4  ;;  %310 = vst.msk [vmem:[#allocation2 + $0x20] sm:$0x1] (!%p198_p2), %vm307_vm3, %v1667_v4  ;;  %v1381_v61 = vld [vmem:[%s1914_s3 + $0x18] sm:$0xf] (!%p198_p2) }
   0xb   : > { %311 = vst.msk [vmem:[#allocation2 + $0x30] sm:$0x1] (!%p198_p2), %vm307_vm3, %v1667_v4  ;;  %312 = vst.msk [vmem:[#allocation2 + $0x40] sm:$0x1] (!%p198_p2), %vm307_vm3, %v1667_v4  ;;  %v1361_v62 = vld [vmem:[%s1914_s3 + $0x8] sm:$0xf] (!%p198_p2) }
   0xc   : > { %313 = vst.msk [vmem:[#allocation2 + $0x50] sm:$0x1] (!%p198_p2), %vm307_vm3, %v1667_v4  ;;  %314 = vst.msk [vmem:[#allocation2 + $0x60] sm:$0x1] (!%p198_p2), %vm307_vm3, %v1667_v4 }
   0xd   : > { %s1918_s19 = smov (!%p230_p3, %s1339_s19), 1  ;;  %315 = vst.msk [vmem:[#allocation2 + $0x70] sm:$0x1] %vm307_vm3, %v1667_v4  ;;  %316 = vst.msk [vmem:[#allocation2 + $0x80] sm:$0x1] %vm307_vm3, %v1667_v4 }
   0xe   : > { %319 = vst.msk [vmem:[#allocation2 + $0x19] sm:$0x1] %vm307_vm3, %v1667_v4  ;;  %320 = vst.msk [vmem:[#allocation2 + $0x29] sm:$0x1] %vm307_vm3, %v1667_v4  ;;  %s1398_s28 = sshll.u32 %s1918_s19, 5  ;;  %s1400_s26 = sshll.u32 %s1918_s19, 6 }
   0xf   : > { %321 = vst.msk [vmem:[#allocation2 + $0x39] sm:$0x1] %vm307_vm3, %v1667_v4  ;;  %322 = vst.msk [vmem:[#allocation2 + $0x49] sm:$0x1] %vm307_vm3, %v1667_v4  ;;  %s234_s6 = scalar_lea.vmem %s1911_s0, %s1398_s28  ;;  %s239_s25 = scalar_lea.vmem %s1915_s4, %s1398_s28 }
  0x10   : > { %323 = vst.msk [vmem:[#allocation2 + $0x59] sm:$0x1] %vm307_vm3, %v1667_v4  ;;  %324 = vst.msk [vmem:[#allocation2 + $0x69] sm:$0x1] %vm307_vm3, %v1667_v4  ;;  %v1402_v8 = vld [vmem:[%s234_s6] sm:$0xff]   ;;  %v1433_v9 = vld [vmem:[%s234_s6 + $0x8] sm:$0xff]   ;;  %s1890_s30 = scalar_lea.vmem %s1916_s5, %s1400_s26 }
  0x11   : > { %325 = vst.msk [vmem:[#allocation2 + $0x79] sm:$0x1] %vm307_vm3, %v1667_v4  ;;  %326 = vst.msk [vmem:[#allocation2 + $0x89] sm:$0x1] %vm307_vm3, %v1667_v4  ;;  %v1434_v10 = vld [vmem:[%s234_s6 + $0x10] sm:$0xff]   ;;  %v1403_v11 = vunpack.c.l.bf16 %v1402_v8  ;;  %v1404_v12 = vunpack.c.h.bf16 %v1402_v8  ;;  %v1407_v13 = vunpack.c.l.bf16 %v1433_v9  ;;  %v1408_v14 = vunpack.c.h.bf16 %v1433_v9  ;;  %v1435_v15 = vld [vmem:[%s234_s6 + $0x18] sm:$0xff]  }
  0x12   : > { %308 = vst.msk [vmem:[#allocation2] sm:$0x1] %vm307_vm3, %v1667_v4  ;;  %318 = vst.msk [vmem:[#allocation2 + $0x9] sm:$0x1] %vm307_vm3, %v1667_v4  ;;  %v1411_v17 = vunpack.c.l.bf16 %v1434_v10  ;;  %v1412_v18 = vunpack.c.h.bf16 %v1434_v10  ;;  %v1415_v19 = vunpack.c.l.bf16 %v1435_v15  ;;  %v1416_v20 = vunpack.c.h.bf16 %v1435_v15  ;;  %v350_v45 = vld [vmem:[#allocation2 + $0x1] sm:$0xff] }
  0x13   : > { %327 = vst.msk [vmem:[#allocation2 + $0x99] sm:$0x1] %vm307_vm3, %v1667_v4  ;;  %317 = vst.msk [vmem:[#allocation2 + $0x90] sm:$0x1] %vm307_vm3, %v1667_v4  ;;  %v269_v21 = vmul.f32 %v1403_v11, %v1350_v7  ;;  %v270_v22 = vmul.f32 %v1404_v12, %v1350_v7  ;;  %v271_v23 = vmul.f32 %v1407_v13, %v1350_v7  ;;  %v961_v15 = vsel %vm376_vm0, %v1381_v61, 0 }
  0x14   : > { %v272_v24 = vmul.f32 %v1408_v14, %v1350_v7  ;;  %v273_v25 = vmul.f32 %v1411_v17, %v1350_v7  ;;  %v274_v26 = vmul.f32 %v1412_v18, %v1350_v7  ;;  %v275_v27 = vmul.f32 %v1415_v19, %v1350_v7  ;;  %v1386_v18 = vld [vmem:[%s1914_s3 + $0x1c] sm:$0xf] }
  0x15   : > { %v276_v28 = vmul.f32 %v1416_v20, %v1350_v7  ;;  %v284_v29 = vadd.f32 %v1351_v16, %v269_v21  ;;  %v285_v30 = vadd.f32 %v1351_v16, %v270_v22  ;;  %v286_v31 = vadd.f32 %v1351_v16, %v271_v23 }
  0x16   : > { %v287_v32 = vadd.f32 %v1351_v16, %v272_v24  ;;  %v288_v33 = vadd.f32 %v1351_v16, %v273_v25  ;;  %v289_v34 = vadd.f32 %v1351_v16, %v274_v26  ;;  %v290_v35 = vadd.f32 %v1351_v16, %v275_v27  ;;  %v1366_v24 = vld [vmem:[%s1914_s3 + $0xc] sm:$0xf] }
  0x17   : > { %v291_v36 = vadd.f32 %v1351_v16, %v276_v28  ;;  %v292_v37 = vmax.f32 %v284_v29, 0.0  ;;  %v293_v38 = vmax.f32 %v285_v30, 0.0  ;;  %v294_v39 = vmax.f32 %v286_v31, 0.0 }
  0x18   : > { %v295_v40 = vmax.f32 %v287_v32, 0.0  ;;  %v296_v41 = vmax.f32 %v288_v33, 0.0  ;;  %v297_v42 = vmax.f32 %v289_v34, 0.0  ;;  %v298_v43 = vmax.f32 %v290_v35, 0.0  ;;  %v1391_v32 = vld [vmem:[%s1914_s3 + $0x20] sm:$0xf] }
  0x19   : > { %v299_v44 = vmax.f32 %v291_v36, 0.0  ;;  %329 = vst.msk [vmem:[#allocation2 + $0x11] sm:$0xff] %vm300_vm1, %v292_v37  ;;  %330 = vst.msk [vmem:[#allocation2 + $0x21] sm:$0xff] %vm300_vm1, %v293_v38  ;;  %v337_v2 = vld [vmem:[#allocation2] sm:$0xff]  ;;  %v552_v23 = vsel %vm376_vm0, %v1361_v62, 0  ;;  %v1063_v31 = vsel %vm376_vm0, %v1386_v18, 0 }
  0x1a   : > { %331 = vst.msk [vmem:[#allocation2 + $0x31] sm:$0xff] %vm300_vm1, %v294_v39  ;;  %332 = vst.msk [vmem:[#allocation2 + $0x41] sm:$0xff] %vm300_vm1, %v295_v40  ;;  %v525_v28 = vld [vmem:[#allocation2 + $0x2] sm:$0xff]  ;;  %v941_v35 = vld [vmem:[#allocation2 + $0x90] sm:$0xff]  ;;  %v654_v37 = vsel %vm376_vm0, %v1366_v24, 0 }
  0x1b   : > { %333 = vst.msk [vmem:[#allocation2 + $0x51] sm:$0xff] %vm300_vm1, %v296_v41  ;;  %334 = vst.msk [vmem:[#allocation2 + $0x61] sm:$0xff] %vm300_vm1, %v297_v42  ;;  %v1165_v41 = vsel %vm376_vm0, %v1391_v32, 0 }
  0x1c   : > { %335 = vst.msk [vmem:[#allocation2 + $0x71] sm:$0xff] %vm300_vm1, %v298_v43  ;;  %336 = vst.msk [vmem:[#allocation2 + $0x81] sm:$0xff] %vm300_vm1, %v299_v44  ;;  %v1043_v43 = vld [vmem:[#allocation2 + $0x91] sm:$0xff] }
  0x20   : > { %v351_v46 = vld [vmem:[#allocation2 + $0x11] sm:$0xff]  ;;  %v730_v47 = vld [vmem:[#allocation2 + $0x21] sm:$0xff] }
  0x21   : > { %v353_v48 = vld [vmem:[#allocation2 + $0x31] sm:$0xff]  ;;  %v358_v49 = vpack.c.bf16 %v351_v46, %v350_v45  ;;  %v737_v50 = vpack.c.bf16 %v730_v47, %v351_v46  ;;  %v732_v52 = vld [vmem:[#allocation2 + $0x41] sm:$0xff] }
  0x22   : > { %v1781_v51 = vpack.c.bf16 %v353_v48, %v730_v47  ;;  %v1783_v53 = vld [vmem:[#allocation2 + $0x51] sm:$0xff]  ;;  %v738_v55 = vpack.c.bf16 %v732_v52, %v353_v48  ;;  %v832_v59 = vld [vmem:[#allocation2 + $0x22] sm:$0xff] }
  0x23   : > { %v1790_v57 = vpack.c.bf16 %v1783_v53, %v732_v52  ;;  %v831_v58 = vld [vmem:[#allocation2 + $0x12] sm:$0xff]  ;;  %1486 = vmatprep.mubr.msk.bf16.mxu1 %vm300_vm1, %v358_v49  ;;  %1526 = vmatprep.mubr.msk.bf16.mxu0 %vm300_vm1, %v737_v50  ;;  %v1803_v63 = vld [vmem:[#allocation2 + $0x61] sm:$0xff] }
  0x24   : > { %v839_v60 = vpack.c.bf16 %v832_v59, %v831_v58  ;;  %1487 = vmatmul.mubr.msk.bf16.vlgmr.msra.gmra.mrb[0].mxu1 %vm300_vm1, %v1781_v51  ;;  %1527 = vmatmul.mubr.msk.bf16.vlgmr.msra.gmra.mrb[0].mxu0 %vm300_vm1, %v738_v55  ;;  %v1805_v0 = vld [vmem:[#allocation2 + $0x71] sm:$0xff]  ;;  %v834_v7 = vld [vmem:[#allocation2 + $0x42] sm:$0xff]  ;;  %v533_v30 = vpack.c.bf16 %v831_v58, %v525_v28  ;;  %v739_v47 = vpack.c.bf16 %v1803_v63, %v1783_v53 }
  0x25   : > { %1495 = vmatpush3.bf16.msra.mxu1 %v458_v54  ;;  %1535 = vmatpush3.bf16.msra.mxu0 %v858_v56  ;;  %v1810_v4 = vld [vmem:[#allocation2 + $0x10] sm:$0xff]  ;;  %v1816_v5 = vpack.c.bf16 %v1805_v0, %v1803_v63  ;;  %v836_v10 = vld [vmem:[#allocation2 + $0x62] sm:$0xff] }
  0x26   : > { %1490 = vmatprep.mubr.msk.bf16.mxu1 %vm300_vm1, %v1790_v57  ;;  %1536 = vmatprep.mubr.msk.bf16.mxu0 %vm300_vm1, %v839_v60  ;;  %v833_v6 = vld [vmem:[#allocation2 + $0x32] sm:$0xff]  ;;  %v345_v8 = vpack.c.bf16 %v1810_v4, %v337_v2  ;;  %v339_v12 = vld [vmem:[#allocation2 + $0x20] sm:$0xff]  ;;  %v1436_v54 = vld [vmem:[%s239_s25 + $0x8] sm:$0xff]  }
  0x27   : > { %1647 = vmatprep.subr.msk.bf16.mxu0 %vm376_vm0, %v1381_v61  ;;  %1642 = vmatprep.subr.msk.bf16.mxu1 %vm376_vm0, %v1361_v62  ;;  %v835_v9 = vld [vmem:[#allocation2 + $0x52] sm:$0xff]  ;;  %v840_v11 = vpack.c.bf16 %v834_v7, %v833_v6  ;;  %v341_v16 = vld [vmem:[#allocation2 + $0x40] sm:$0xff]  ;;  %v534_v33 = vpack.c.bf16 %v833_v6, %v832_v59  ;;  %v635_v40 = vpack.c.bf16 %v339_v12, %v1810_v4  ;;  %v1423_v56 = vunpack.c.l.bf16 %v1436_v54 }
  0x28   : > { %v340_v13 = vld [vmem:[#allocation2 + $0x30] sm:$0xff]  ;;  %v841_v14 = vpack.c.bf16 %v836_v10, %v835_v9  ;;  %v1828_v21 = vld [vmem:[#allocation2 + $0x82] sm:$0xff]  ;;  %v535_v36 = vpack.c.bf16 %v835_v9, %v834_v7  ;;  %v1424_v61 = vunpack.c.h.bf16 %v1436_v54 }
  0x29   : > { %v342_v17 = vld [vmem:[#allocation2 + $0x50] sm:$0xff]  ;;  %v346_v19 = vpack.c.bf16 %v340_v13, %v339_v12  ;;  %v343_v26 = vld [vmem:[#allocation2 + $0x60] sm:$0xff]  ;;  %v636_v42 = vpack.c.bf16 %v341_v16, %v340_v13 }
  0x2a   : > { %v837_v20 = vld [vmem:[#allocation2 + $0x72] sm:$0xff]  ;;  %v347_v22 = vpack.c.bf16 %v342_v17, %v341_v16  ;;  %v940_v34 = vld [vmem:[#allocation2 + $0x80] sm:$0xff]  ;;  %v637_v44 = vpack.c.bf16 %v343_v26, %v342_v17 }
  0x2b   : > { %v842_v25 = vpack.c.bf16 %v1828_v21, %v837_v20  ;;  %v344_v27 = vld [vmem:[#allocation2 + $0x70] sm:$0xff]  ;;  %v945_v38 = vpack.c.bf16 %v941_v35, %v940_v34  ;;  %v536_v39 = vpack.c.bf16 %v837_v20, %v836_v10  ;;  %v1418_v55 = vld [vmem:[%s239_s25] sm:$0xff]  }
  0x2c   : > { %1491 = vmatmul.mubr.msk.bf16.gmra.mrb[4].mxu1 %vm300_vm1, %v1816_v5  ;;  %v348_v29 = vpack.c.bf16 %v344_v27, %v343_v26  ;;  %v638_v46 = vpack.c.bf16 %v940_v34, %v344_v27  ;;  %v1419_v58 = vunpack.c.l.bf16 %v1418_v55  ;;  %v1437_v10 = vld [vmem:[%s239_s25 + $0x10] sm:$0xff]  }
  0x2d   : > { %1496 = vmatprep.mubr.msk.bf16.mxu1 %vm300_vm1, %v345_v8  ;;  %v1438_v8 = vld [vmem:[%s239_s25 + $0x18] sm:$0xff]  }
  0x2e   : > { %v1431_v12 = vunpack.c.l.bf16 %v1438_v8 }
  0x30   : > { %1537 = vmatmul.mubr.msk.bf16.vlgmr.msra.gmra.mrb[0].mxu0 %vm300_vm1, %v840_v11 }
  0x31   : > { %1545 = vmatpush3.bf16.msra.mxu0 %v961_v15  ;;  %1540 = vmatprep.mubr.msk.bf16.mxu0 %vm300_vm1, %v841_v14  ;;  %v1427_v15 = vunpack.c.l.bf16 %v1437_v10 }
  0x32   : > { %1648 = vmatprep.subr.msk.bf16.mxu0 %vm376_vm0, %v1386_v18 }
  0x34   : > { %1497 = vmatmul.mubr.msk.bf16.vlgmr.msra.gmra.mrb[0].mxu1 %vm300_vm1, %v346_v19 }
  0x35   : > { %1505 = vmatpush3.bf16.msra.mxu1 %v552_v23  ;;  %1500 = vmatprep.mubr.msk.bf16.mxu1 %vm300_vm1, %v347_v22  ;;  %v1428_v23 = vunpack.c.h.bf16 %v1437_v10 }
  0x36   : > { %1643 = vmatprep.subr.msk.bf16.mxu1 %vm376_vm0, %v1366_v24 }
  0x38   : > { %1541 = vmatmul.mubr.msk.bf16.gmra.mrb[4].mxu0 %vm300_vm1, %v842_v25 }
  0x39   : > { %1546 = vmatprep.mubr.msk.bf16.mxu0 %vm300_vm1, %v346_v19  ;;  %v1432_v19 = vunpack.c.h.bf16 %v1438_v8 }
  0x3c   : > { %1501 = vmatmul.mubr.msk.bf16.gmra.mrb[4].mxu1 %vm300_vm1, %v348_v29 }
  0x3d   : > { %1506 = vmatprep.mubr.msk.bf16.mxu1 %vm300_vm1, %v533_v30 }
  0x40   : > { %1547 = vmatmul.mubr.msk.bf16.vlgmr.msra.gmra.mrb[0].mxu0 %vm300_vm1, %v347_v22 }
  0x41   : > { %1555 = vmatpush3.bf16.msra.mxu0 %v1063_v31  ;;  %1550 = vmatprep.mubr.msk.bf16.mxu0 %vm300_vm1, %v348_v29 }
  0x42   : > { %1649 = vmatprep.subr.msk.bf16.mxu0 %vm376_vm0, %v1391_v32 }
  0x44   : > { %1507 = vmatmul.mubr.msk.bf16.vlgmr.msra.gmra.mrb[0].mxu1 %vm300_vm1, %v534_v33 }
  0x45   : > { %1515 = vmatpush3.bf16.msra.mxu1 %v654_v37  ;;  %1510 = vmatprep.mubr.msk.bf16.mxu1 %vm300_vm1, %v535_v36 }
  0x46   : > { %1645 = vmatprep.subr.msk.bf16.mxu1 %vm376_vm0, %v1712_v1  ;;  %v1042_v1 = vld [vmem:[#allocation2 + $0x81] sm:$0xff] }
  0x47   : > { %v1047_v45 = vpack.c.bf16 %v1043_v43, %v1042_v1  ;;  %v740_v48 = vpack.c.bf16 %v1042_v1, %v1805_v0  ;;  %v1420_v0 = vunpack.c.h.bf16 %v1418_v55 }
  0x48   : > { %1551 = vmatmul.mubr.msk.bf16.gmra.mrb[4].mxu0 %vm300_vm1, %v945_v38 }
  0x49   : > { %1556 = vmatprep.mubr.msk.bf16.mxu0 %vm300_vm1, %v1781_v51 }
  0x4c   : > { %1511 = vmatmul.mubr.msk.bf16.gmra.mrb[4].mxu1 %vm300_vm1, %v536_v39 }
  0x4d   : > { %1516 = vmatprep.mubr.msk.bf16.mxu1 %vm300_vm1, %v635_v40 }
  0x50   : > { %1557 = vmatmul.mubr.msk.bf16.vlgmr.msra.gmra.mrb[0].mxu0 %vm300_vm1, %v1790_v57 }
  0x51   : > { %1565 = vmatpush3.bf16.msra.mxu0 %v1165_v41  ;;  %1560 = vmatprep.mubr.msk.bf16.mxu0 %vm300_vm1, %v1816_v5 }
  0x54   : > { %1517 = vmatmul.mubr.msk.bf16.vlgmr.msra.gmra.mrb[0].mxu1 %vm300_vm1, %v636_v42 }
  0x55   : > { %1575 = vmatpush3.bf16.msra.mxu1 %v1720_v3  ;;  %1520 = vmatprep.mubr.msk.bf16.mxu1 %vm300_vm1, %v637_v44  ;;  %v1145_v3 = vld [vmem:[#allocation2 + $0x92] sm:$0xff] }
  0x56   : > { %v1149_v49 = vpack.c.bf16 %v1145_v3, %v1828_v21 }
  0x58   : > { %1561 = vmatmul.mubr.msk.bf16.gmra.mrb[4].mxu0 %vm300_vm1, %v1047_v45 }
  0x59   : > { %1566 = vmatprep.mubr.msk.bf16.mxu0 %vm300_vm1, %v534_v33 }
  0x5c   : > { %1521 = vmatmul.mubr.msk.bf16.gmra.mrb[4].mxu1 %vm300_vm1, %v638_v46 }
  0x5d   : > { %1530 = vmatprep.mubr.msk.bf16.mxu1 %vm300_vm1, %v739_v47 }
  0x60   : > { %1567 = vmatmul.mubr.msk.bf16.vlgmr.msra.gmra.mrb[0].mxu0 %vm300_vm1, %v535_v36 }
  0x61   : > { %1570 = vmatprep.mubr.msk.bf16.mxu0 %vm300_vm1, %v536_v39 }
  0x68   : > { %1531 = vmatmul.mubr.msk.bf16.vlgmr.msra.gmra.mrb[4].mxu1 %vm300_vm1, %v740_v48  ;;  %1571 = vmatmul.mubr.msk.bf16.gmra.mrb[4].mxu0 %vm300_vm1, %v1149_v49 }
 0x127   : > { %v1518_v50 = vpop.f32.mrb[0].mxu1 }
 0x128   : > { %v690_v51 = vpop.f32.mrb[1].mxu1 }
 0x129   : > { %v1519_v52 = vpop.f32.mrb[2].mxu1 }
 0x12a   : > { %v693_v53 = vpop.f32.mrb[3].mxu1 }
 0x133   : > { %v1568_v57 = vpop.f32.mrb[0].mxu0 }
 0x134   : > { %v1576_v59 = vadd.f32 %v1568_v57, %v1518_v50  ;;  %v1201_v60 = vpop.f32.mrb[1].mxu0 }
 0x135   : > { %v1577_v62 = vadd.f32 %v1201_v60, %v690_v51  ;;  %v1569_v63 = vpop.f32.mrb[2].mxu0 }
 0x136   : > { %v1258_v2 = vadd.f32 %v1576_v59, %v1423_v56  ;;  %v1578_v4 = vadd.f32 %v1569_v63, %v1519_v52  ;;  %v1204_v5 = vpop.f32.mrb[3].mxu0 }
 0x137   : > { %v1256_v6 = vadd.f32 %v1577_v62, %v1419_v58  ;;  %v1579_v7 = vadd.f32 %v1204_v5, %v693_v53 }
 0x138   : > { %1266 = vst.msk [vmem:[%s1890_s30 + $0x10] sm:$0xff] %vm300_vm1, %v1258_v2  ;;  %v1259_v9 = vadd.f32 %v1578_v4, %v1424_v61 }
 0x139   : > { %1264 = vst.msk [vmem:[%s1890_s30] sm:$0xff] %vm300_vm1, %v1256_v6  ;;  %v1257_v11 = vadd.f32 %v1579_v7, %v1420_v0 }
 0x13a   : > { %1267 = vst.msk [vmem:[%s1890_s30 + $0x18] sm:$0xff] %vm300_vm1, %v1259_v9 }
 0x13b   : > { %1265 = vst.msk [vmem:[%s1890_s30 + $0x8] sm:$0xff] %vm300_vm1, %v1257_v11  ;;  %v1532_v13 = vpop.f32.mrb[4].mxu1  ;;  %v1572_v14 = vpop.f32.mrb[4].mxu0 }
 0x13c   : > { %v1580_v16 = vadd.f32 %v1572_v14, %v1532_v13  ;;  %v808_v17 = vpop.f32.mrb[5].mxu1  ;;  %v1217_v18 = vpop.f32.mrb[5].mxu0 }
 0x13d   : > { %v1581_v20 = vadd.f32 %v1217_v18, %v808_v17  ;;  %v1533_v21 = vpop.f32.mrb[6].mxu1  ;;  %v1573_v22 = vpop.f32.mrb[6].mxu0 }
 0x13e   : > { %v1262_v24 = vadd.f32 %v1580_v16, %v1431_v12  ;;  %v1582_v25 = vadd.f32 %v1573_v22, %v1533_v21  ;;  %v811_v26 = vpop.f32.mrb[7].mxu1  ;;  %v1220_v27 = vpop.f32.mrb[7].mxu0 }
 0x13f   : > { %v1260_v28 = vadd.f32 %v1581_v20, %v1427_v15  ;;  %v1583_v29 = vadd.f32 %v1220_v27, %v811_v26 }
 0x140   : > { %1270 = vst.msk [vmem:[%s1890_s30 + $0x30] sm:$0xff] %vm300_vm1, %v1262_v24  ;;  %v1263_v30 = vadd.f32 %v1582_v25, %v1432_v19 }
 0x141   : > { %1268 = vst.msk [vmem:[%s1890_s30 + $0x20] sm:$0xff] %vm300_vm1, %v1260_v28  ;;  %v1261_v31 = vadd.f32 %v1583_v29, %v1428_v23 }
 0x142   : > { %1271 = vst.msk [vmem:[%s1890_s30 + $0x38] sm:$0xff] %vm300_vm1, %v1263_v30 }
 0x143   : > { %1269 = vst.msk [vmem:[%s1890_s30 + $0x28] sm:$0xff] %vm300_vm1, %v1261_v31 }
 0x144 PF: > { %s15_s18 = sadd.s32 1, %s1665_s18  }
 0x145   : > { %p12_p4 = scmp.ge.s32.totalorder %s15_s18, 4  }
 0x147   :  { %14 = sbr.rel (!%p12_p4) target bundleno = 1 (0x1), region = 84 }

</bundles_post_ra>
